<compile_context>
chip_gen: v7x
topology: tpu7x:2x2x1
jax: 0.10.0
libtpu: 0.0.40
codegen_flags: <defaults>
</compile_context>

<pallas_src>
import jax
import jax.numpy as jnp
from jax.experimental import pallas as pl
from jax.experimental.pallas import tpu as pltpu


def _roundup8(n):
    return ((n + 7) // 8) * 8


# ---------------------------------------------------------------------------
# Fused kernel body (only 2-D MXU dots, aligned slices and elementwise ops)
# ---------------------------------------------------------------------------
def _conv_block(act, m_ref, b_ref):
    """Valid stride-1 conv + bias + ReLU on batch-folded rows.

    act:   (R, Lin)  f32 activation, lanes ordered (w, c) with c minor.
    m_ref: (KH, Lin_pad, Lout) bf16 Toeplitz weights (Lin_pad >= Lin lanes of act).
    b_ref: (1, Lout) f32 bias row (bias tiled over wo).
    Returns (R - KH + 1, Lout) f32.  Rows whose window crosses an image
    boundary are garbage but are filtered by the downstream selectors.
    """
    kh = m_ref.shape[0]
    l_out = act.shape[0] - kh + 1
    a16 = act.astype(jnp.bfloat16)
    t = jnp.dot(a16[0:l_out, :], m_ref[0], preferred_element_type=jnp.float32)
    for ky in range(1, kh):
        t += jnp.dot(a16[ky:ky + l_out, :], m_ref[ky],
                     preferred_element_type=jnp.float32)
    return jnp.maximum(t + b_ref[...], 0.0)


def _pool_block(act, colsel_ref, rowsel_ref):
    """MaxPool2d(2, 2) via merged 0/1 selector matmuls + elementwise max.

    act:         (R, Lc) f32 conv output (batch-folded rows).
    colsel_ref:  (Lc, 256) bf16; even-w selector in lanes [0, half), odd-w
                 selector starting at lane 128 (128-aligned split -> no XLU
                 lane shuffles).
    rowsel_ref:  (2*Rp, R) bf16; even-h selector in rows [0, Rp), odd-h in
                 rows [Rp, 2*Rp) (Rp is a multiple of 8).  Block-diagonal over
                 batch; also extracts only the valid conv rows per image.
    Returns (Rp, 128) f32 with valid lanes [0, half) and valid rows
    [0, N * Ho/2); padding rows/lanes are exactly zero.
    """
    u = jnp.dot(act.astype(jnp.bfloat16), colsel_ref[...],
                preferred_element_type=jnp.float32)          # (R, 256)
    cmax = jnp.maximum(u[:, 0:128], u[:, 128:256])           # (R, 128)
    v = jnp.dot(rowsel_ref[...], cmax.astype(jnp.bfloat16),
                preferred_element_type=jnp.float32)          # (2*Rp, 128)
    rp = rowsel_ref.shape[0] // 2
    return jnp.maximum(v[0:rp, :], v[rp:2 * rp, :])          # (Rp, 128)


def _lenet_kernel(x_ref,
                  c1m_ref, c1b_ref, p1c_ref, p1r_ref,
                  c2m_ref, c2b_ref, p2c_ref, p2r_ref,
                  c3m_ref, c3b_ref,
                  ext_ref, l1w_ref, l1b_ref, l2w_ref, l2b_ref,
                  out_ref):
    n_batch = out_ref.shape[0]

    a = x_ref[...]                                # (N*32, 96)   f32
    a = _conv_block(a, c1m_ref, c1b_ref)          # (N*32-4, 168)
    a = _pool_block(a, p1c_ref, p1r_ref)          # (rp1, 128)   valid rows N*14
    a = _conv_block(a, c2m_ref, c2b_ref)          # (rp1-4, 160)
    a = _pool_block(a, p2c_ref, p2r_ref)          # (rp2, 128)   valid rows N*5
    a = _conv_block(a, c3m_ref, c3b_ref)          # (rp2-3, 240)

    # Head: one dot extracts, per image, conv3 output row 0 (first block of
    # rows) and row 1 (second block), both blocks 8-row aligned.
    g = jnp.dot(ext_ref[...], a.astype(jnp.bfloat16),
                preferred_element_type=jnp.float32)           # (2*npad, 240)
    npad = ext_ref.shape[0] // 2
    g16 = g.astype(jnp.bfloat16)

    # linear1 (flatten order folded into the pre-permuted weights) + ReLU.
    h = jnp.dot(g16[0:npad, :], l1w_ref[0], preferred_element_type=jnp.float32)
    h += jnp.dot(g16[npad:2 * npad, :], l1w_ref[1],
                 preferred_element_type=jnp.float32)
    h = jnp.maximum(h + l1b_ref[...], 0.0)                    # (npad, 84)

    # linear2 + single store of the logits.
    y = jnp.dot(h.astype(jnp.bfloat16), l2w_ref[...],
                preferred_element_type=jnp.float32) + l2b_ref[...]
    out_ref[...] = y[0:n_batch, :].astype(out_ref.dtype)


# ---------------------------------------------------------------------------
# Forward pass: one pallas_call, whole arrays resident in VMEM
# ---------------------------------------------------------------------------
def lenet_forward(prep, x_nchw):
    N, C, H, W = x_nchw.shape
    # NCHW -> batch-folded (N*H, W*C) rows, lanes = (w, c) with c minor.
    # (If the producer can emit NHWC / (N*H, W*C) directly, drop this relayout
    #  to save one XLA dispatch in front of the fused kernel.)
    x = jnp.transpose(x_nchw, (0, 2, 3, 1)).reshape(N * H, W * C)
    vmem = pl.BlockSpec(memory_space=pltpu.MemorySpace.VMEM)
    return pl.pallas_call(
        _lenet_kernel,
        out_shape=jax.ShapeDtypeStruct((N, 10), jnp.float32),
        in_specs=[vmem] * (1 + len(prep)),
        out_specs=vmem,
    )(x, *prep)


# ---------------------------------------------------------------------------
# One-time parameter repacking (runs outside the jitted forward)
# ---------------------------------------------------------------------------
def _toeplitz_conv_mats(w_oihw, w_in, pad_rows=None):
    """Per-ky matrices M_ky[w*C + c, wo*O + o] = w[o, c, ky, w - wo] (0 outside)."""
    O, C, KH, KW = w_oihw.shape
    wo_n = w_in - KW + 1
    w_idx = jnp.arange(w_in)[:, None]          # (W, 1)
    wo_idx = jnp.arange(wo_n)[None, :]         # (1, Wo)
    kx = w_idx - wo_idx                        # (W, Wo)
    valid = (kx >= 0) & (kx < KW)
    kx_c = jnp.clip(kx, 0, KW - 1)
    mats = []
    for ky in range(KH):
        wk = w_oihw[:, :, ky, :]               # (O, C, KW)
        g = wk[:, :, kx_c]                     # (O, C, W, Wo)
        g = jnp.where(valid[None, None, :, :], g, 0.0)
        m = jnp.transpose(g, (2, 1, 3, 0)).reshape(w_in * C, wo_n * O)
        mats.append(m)
    m = jnp.stack(mats, axis=0)                # (KH, W*C, Wo*O)
    if pad_rows is not None and pad_rows > w_in * C:
        m = jnp.pad(m, ((0, 0), (0, pad_rows - w_in * C), (0, 0)))
    return m.astype(jnp.bfloat16)


def _pool_col_merged(w_in, ch):
    """Merged even/odd column selector, odd half starting at lane 128."""
    w2 = w_in // 2
    half = w2 * ch
    assert half <= 128
    m = jnp.zeros((w_in * ch, 256), jnp.float32)
    wp = jnp.arange(w2)
    c = jnp.arange(ch)
    rows_e = ((2 * wp[:, None]) * ch + c[None, :]).reshape(-1)
    rows_o = ((2 * wp[:, None] + 1) * ch + c[None, :]).reshape(-1)
    cols = (wp[:, None] * ch + c[None, :]).reshape(-1)
    m = m.at[rows_e, cols].set(1.0)
    m = m.at[rows_o, cols + 128].set(1.0)
    return m.astype(jnp.bfloat16)


def _pool_row_merged(n_batch, row_stride, ho_conv, l_rows):
    """Merged even/odd row selector, block-diagonal over batch.

    Picks conv-output row n*row_stride + 2*hp (+1 for the odd half) for image
    n and pool row hp, writing it to output row n*(ho_conv//2) + hp.  The odd
    half starts at row Rp (multiple of 8) so the kernel split is aligned.
    """
    hp_n = ho_conv // 2
    rp = _roundup8(n_batch * hp_n)
    m = jnp.zeros((2 * rp, l_rows), jnp.float32)
    n = jnp.arange(n_batch)
    hp = jnp.arange(hp_n)
    out_rows = (n[:, None] * hp_n + hp[None, :]).reshape(-1)
    in_even = (n[:, None] * row_stride + 2 * hp[None, :]).reshape(-1)
    m = m.at[out_rows, in_even].set(1.0)
    m = m.at[rp + out_rows, in_even + 1].set(1.0)
    return m.astype(jnp.bfloat16)


def _head_extract(n_batch, row_stride, l_rows):
    """Selector whose first 8-row block extracts conv3 row 0 per image,
    second block extracts conv3 row 1 per image."""
    npad = _roundup8(max(n_batch, 1))
    m = jnp.zeros((2 * npad, l_rows), jnp.float32)
    n = jnp.arange(n_batch)
    m = m.at[n, n * row_stride].set(1.0)
    m = m.at[npad + n, n * row_stride + 1].set(1.0)
    return m.astype(jnp.bfloat16)


def prepare_params(params, n_batch):
    """Repack PyTorch-layout params into the kernel's VMEM/MXU-friendly form."""
    w1, b1 = params["conv1"]      # (6, 3, 5, 5)
    w2, b2 = params["conv2"]      # (16, 6, 5, 5)
    w3, b3 = params["conv3"]      # (120, 16, 4, 4)
    wl1, bl1 = params["linear1"]  # (84, 480)
    wl2, bl2 = params["linear2"]  # (10, 84)

    # conv1 / pool1 (input 32x32x3, conv out 28x28x6, pool out 14x14x6)
    c1m = _toeplitz_conv_mats(w1, 32)                       # (5, 96, 168) bf16
    c1b = jnp.tile(b1, 28)[None, :].astype(jnp.float32)     # (1, 168)
    p1c = _pool_col_merged(28, 6)                           # (168, 256) bf16
    p1r = _pool_row_merged(n_batch, 32, 28, n_batch * 32 - 4)
    rp1 = _roundup8(n_batch * 14)

    # conv2 / pool2 (input 14x14x6 padded to 128 lanes, conv out 10x10x16)
    c2m = _toeplitz_conv_mats(w2, 14, pad_rows=128)         # (5, 128, 160)
    c2b = jnp.tile(b2, 10)[None, :].astype(jnp.float32)     # (1, 160)
    p2c = _pool_col_merged(10, 16)                          # (160, 256)
    p2r = _pool_row_merged(n_batch, 14, 10, rp1 - 4)
    rp2 = _roundup8(n_batch * 5)

    # conv3 (input 5x5x16 padded to 128 lanes, conv out 2x2x120)
    c3m = _toeplitz_conv_mats(w3, 5, pad_rows=128)          # (4, 128, 240)
    c3b = jnp.tile(b3, 2)[None, :].astype(jnp.float32)      # (1, 240)
    ext = _head_extract(n_batch, 5, rp2 - 3)                # (2*npad, rp2-3)

    # linear1: permute columns from PyTorch (c, h, w) flatten order to the
    # kernel's per-row (w, c) activation layout; one (240, 84) matrix per
    # conv3 output row h.
    l1w = jnp.transpose(wl1.reshape(84, 120, 2, 2),
                        (2, 3, 1, 0)).reshape(2, 240, 84).astype(jnp.bfloat16)
    l1b = bl1[None, :].astype(jnp.float32)                  # (1, 84)
    l2w = jnp.transpose(wl2, (1, 0)).astype(jnp.bfloat16)   # (84, 10)
    l2b = bl2[None, :].astype(jnp.float32)                  # (1, 10)

    return (c1m, c1b, p1c, p1r,
            c2m, c2b, p2c, p2r,
            c3m, c3b,
            ext, l1w, l1b, l2w, l2b)


# ---------------------------------------------------------------------------
# Parameters (deterministic, PyTorch-default-style uniform init)
# ---------------------------------------------------------------------------
def init_params(key):
    def conv_init(k, o, c, kk):
        k1, k2 = jax.random.split(k)
        bound = 1.0 / float(c * kk * kk) ** 0.5
        w = jax.random.uniform(k1, (o, c, kk, kk), jnp.float32, -bound, bound)
        b = jax.random.uniform(k2, (o,), jnp.float32, -bound, bound)
        return w, b

    def lin_init(k, o, i):
        k1, k2 = jax.random.split(k)
        bound = 1.0 / float(i) ** 0.5
        w = jax.random.uniform(k1, (o, i), jnp.float32, -bound, bound)
        b = jax.random.uniform(k2, (o,), jnp.float32, -bound, bound)
        return w, b

    ks = jax.random.split(key, 5)
    return {
        "conv1": conv_init(ks[0], 6, 3, 5),
        "conv2": conv_init(ks[1], 16, 6, 5),
        "conv3": conv_init(ks[2], 120, 16, 4),
        "linear1": lin_init(ks[3], 84, 120 * 2 * 2),
        "linear2": lin_init(ks[4], 10, 84),
    }


# ---------------------------------------------------------------------------
# Pure-JAX reference (mirrors the PyTorch module) for a sanity check
# ---------------------------------------------------------------------------
def lenet_reference(params, x):
    def conv(x, w, b):
        y = jax.lax.conv_general_dilated(
            x, w, window_strides=(1, 1), padding="VALID",
            dimension_numbers=("NCHW", "OIHW", "NCHW"))
        return jax.nn.relu(y + b[None, :, None, None])

    def pool(x):
        return jax.lax.reduce_window(x, -jnp.inf, jax.lax.max,
                                     (1, 1, 2, 2), (1, 1, 2, 2), "VALID")

    w, b = params["conv1"]; x = pool(conv(x, w, b))
    w, b = params["conv2"]; x = pool(conv(x, w, b))
    w, b = params["conv3"]; x = conv(x, w, b)
    x = x.reshape(x.shape[0], -1)
    w, b = params["linear1"]; x = jax.nn.relu(x @ w.T + b)
    w, b = params["linear2"]; x = x @ w.T + b
    return x


if __name__ == "__main__":
    key = jax.random.PRNGKey(0)
    k_param, k_x = jax.random.split(key)
    params = init_params(k_param)

    n_batch = 2
    prep = prepare_params(params, n_batch)   # one-time weight repack (outside jit)

    # Spatial size 32x32 / 3 channels are fixed by the module (conv3 -> 120*2*2).
    x = jax.random.normal(k_x, (n_batch, 3, 32, 32), dtype=jnp.float32)

    fwd = jax.jit(lenet_forward)
    out = jax.block_until_ready(fwd(prep, x))
    assert out.shape == (n_batch, 10) and out.dtype == jnp.float32

    # Sanity check against a pure-JAX reference.  Loose tolerance: the kernel
    # keeps bf16 MXU operands (equivalent to DEFAULT-precision f32 matmul).
    ref = jax.block_until_ready(lenet_reference(params, x))
    assert float(jnp.max(jnp.abs(out - ref))) < 5e-2

    print("KERNEL_OK")
</pallas_src>

<mosaic_0001>
module attributes {stable_mosaic.version = 11 : i64} {
  func.func @_lenet_kernel(%arg0: memref<64x96xf32, #tpu.memory_space<vmem>>, %arg1: memref<5x96x168xbf16, #tpu.memory_space<vmem>>, %arg2: memref<1x168xf32, #tpu.memory_space<vmem>>, %arg3: memref<168x256xbf16, #tpu.memory_space<vmem>>, %arg4: memref<64x60xbf16, #tpu.memory_space<vmem>>, %arg5: memref<5x128x160xbf16, #tpu.memory_space<vmem>>, %arg6: memref<1x160xf32, #tpu.memory_space<vmem>>, %arg7: memref<160x256xbf16, #tpu.memory_space<vmem>>, %arg8: memref<32x28xbf16, #tpu.memory_space<vmem>>, %arg9: memref<4x128x240xbf16, #tpu.memory_space<vmem>>, %arg10: memref<1x240xf32, #tpu.memory_space<vmem>>, %arg11: memref<16x13xbf16, #tpu.memory_space<vmem>>, %arg12: memref<2x240x84xbf16, #tpu.memory_space<vmem>>, %arg13: memref<1x84xf32, #tpu.memory_space<vmem>>, %arg14: memref<84x10xbf16, #tpu.memory_space<vmem>>, %arg15: memref<1x10xf32, #tpu.memory_space<vmem>>, %arg16: memref<2x10xf32, #tpu.memory_space<vmem>>) attributes {dimension_semantics = [], scalar_prefetch = 0 : i64, scratch_operands = 0 : i64, tpu.core_type = #tpu.core_type<tc>} {
    %c0 = arith.constant 0 : index
    %c0_0 = arith.constant 0 : index
    %0 = vector.load %arg0[%c0, %c0_0] : memref<64x96xf32, #tpu.memory_space<vmem>>, vector<64x96xf32>
    %1 = arith.truncf %0 : vector<64x96xf32> to vector<64x96xbf16>
    %2 = vector.extract_strided_slice %1 {offsets = [0, 0], sizes = [60, 96], strides = [1, 1]} : vector<64x96xbf16> to vector<60x96xbf16>
    %c0_1 = arith.constant 0 : index
    %c0_2 = arith.constant 0 : index
    %c0_3 = arith.constant 0 : index
    %3 = vector.load %arg1[%c0_1, %c0_2, %c0_3] : memref<5x96x168xbf16, #tpu.memory_space<vmem>>, vector<1x96x168xbf16>
    %4 = vector.shape_cast %3 : vector<1x96x168xbf16> to vector<96x168xbf16>
    %cst = arith.constant dense<0.000000e+00> : vector<60x168xf32>
    %5 = tpu.matmul %2, %4, %cst {dimension_numbers = #tpu.dot_dimension_numbers<[1], [0], [0], [1], [0, 0, 1, 1], [], []>} : vector<60x96xbf16>, vector<96x168xbf16>, vector<60x168xf32> -> vector<60x168xf32>
    %6 = vector.extract_strided_slice %1 {offsets = [1, 0], sizes = [60, 96], strides = [1, 1]} : vector<64x96xbf16> to vector<60x96xbf16>
    %c1 = arith.constant 1 : index
    %c0_4 = arith.constant 0 : index
    %c0_5 = arith.constant 0 : index
    %7 = vector.load %arg1[%c1, %c0_4, %c0_5] : memref<5x96x168xbf16, #tpu.memory_space<vmem>>, vector<1x96x168xbf16>
    %8 = vector.shape_cast %7 : vector<1x96x168xbf16> to vector<96x168xbf16>
    %cst_6 = arith.constant dense<0.000000e+00> : vector<60x168xf32>
    %9 = tpu.matmul %6, %8, %cst_6 {dimension_numbers = #tpu.dot_dimension_numbers<[1], [0], [0], [1], [0, 0, 1, 1], [], []>} : vector<60x96xbf16>, vector<96x168xbf16>, vector<60x168xf32> -> vector<60x168xf32>
    %10 = arith.addf %5, %9 : vector<60x168xf32>
    %11 = vector.extract_strided_slice %1 {offsets = [2, 0], sizes = [60, 96], strides = [1, 1]} : vector<64x96xbf16> to vector<60x96xbf16>
    %c2 = arith.constant 2 : index
    %c0_7 = arith.constant 0 : index
    %c0_8 = arith.constant 0 : index
    %12 = vector.load %arg1[%c2, %c0_7, %c0_8] : memref<5x96x168xbf16, #tpu.memory_space<vmem>>, vector<1x96x168xbf16>
    %13 = vector.shape_cast %12 : vector<1x96x168xbf16> to vector<96x168xbf16>
    %cst_9 = arith.constant dense<0.000000e+00> : vector<60x168xf32>
    %14 = tpu.matmul %11, %13, %cst_9 {dimension_numbers = #tpu.dot_dimension_numbers<[1], [0], [0], [1], [0, 0, 1, 1], [], []>} : vector<60x96xbf16>, vector<96x168xbf16>, vector<60x168xf32> -> vector<60x168xf32>
    %15 = arith.addf %10, %14 : vector<60x168xf32>
    %16 = vector.extract_strided_slice %1 {offsets = [3, 0], sizes = [60, 96], strides = [1, 1]} : vector<64x96xbf16> to vector<60x96xbf16>
    %c3 = arith.constant 3 : index
    %c0_10 = arith.constant 0 : index
    %c0_11 = arith.constant 0 : index
    %17 = vector.load %arg1[%c3, %c0_10, %c0_11] : memref<5x96x168xbf16, #tpu.memory_space<vmem>>, vector<1x96x168xbf16>
    %18 = vector.shape_cast %17 : vector<1x96x168xbf16> to vector<96x168xbf16>
    %cst_12 = arith.constant dense<0.000000e+00> : vector<60x168xf32>
    %19 = tpu.matmul %16, %18, %cst_12 {dimension_numbers = #tpu.dot_dimension_numbers<[1], [0], [0], [1], [0, 0, 1, 1], [], []>} : vector<60x96xbf16>, vector<96x168xbf16>, vector<60x168xf32> -> vector<60x168xf32>
    %20 = arith.addf %15, %19 : vector<60x168xf32>
    %21 = vector.extract_strided_slice %1 {offsets = [4, 0], sizes = [60, 96], strides = [1, 1]} : vector<64x96xbf16> to vector<60x96xbf16>
    %c4 = arith.constant 4 : index
    %c0_13 = arith.constant 0 : index
    %c0_14 = arith.constant 0 : index
    %22 = vector.load %arg1[%c4, %c0_13, %c0_14] : memref<5x96x168xbf16, #tpu.memory_space<vmem>>, vector<1x96x168xbf16>
    %23 = vector.shape_cast %22 : vector<1x96x168xbf16> to vector<96x168xbf16>
    %cst_15 = arith.constant dense<0.000000e+00> : vector<60x168xf32>
    %24 = tpu.matmul %21, %23, %cst_15 {dimension_numbers = #tpu.dot_dimension_numbers<[1], [0], [0], [1], [0, 0, 1, 1], [], []>} : vector<60x96xbf16>, vector<96x168xbf16>, vector<60x168xf32> -> vector<60x168xf32>
    %25 = arith.addf %20, %24 : vector<60x168xf32>
    %c0_16 = arith.constant 0 : index
    %c0_17 = arith.constant 0 : index
    %26 = vector.load %arg2[%c0_16, %c0_17] : memref<1x168xf32, #tpu.memory_space<vmem>>, vector<1x168xf32>
    %27 = vector.broadcast %26 : vector<1x168xf32> to vector<60x168xf32>
    %28 = arith.addf %25, %27 : vector<60x168xf32>
    %cst_18 = arith.constant 0.000000e+00 : f32
    %29 = vector.broadcast %cst_18 : f32 to vector<60x168xf32>
    %30 = arith.maximumf %28, %29 : vector<60x168xf32>
    %31 = arith.truncf %30 : vector<60x168xf32> to vector<60x168xbf16>
    %c0_19 = arith.constant 0 : index
    %c0_20 = arith.constant 0 : index
    %32 = vector.load %arg3[%c0_19, %c0_20] : memref<168x256xbf16, #tpu.memory_space<vmem>>, vector<168x256xbf16>
    %cst_21 = arith.constant dense<0.000000e+00> : vector<60x256xf32>
    %33 = tpu.matmul %31, %32, %cst_21 {dimension_numbers = #tpu.dot_dimension_numbers<[1], [0], [0], [1], [0, 0, 1, 1], [], []>} : vector<60x168xbf16>, vector<168x256xbf16>, vector<60x256xf32> -> vector<60x256xf32>
    %34 = vector.extract_strided_slice %33 {offsets = [0, 0], sizes = [60, 128], strides = [1, 1]} : vector<60x256xf32> to vector<60x128xf32>
    %35 = vector.extract_strided_slice %33 {offsets = [0, 128], sizes = [60, 128], strides = [1, 1]} : vector<60x256xf32> to vector<60x128xf32>
    %36 = arith.maximumf %34, %35 : vector<60x128xf32>
    %c0_22 = arith.constant 0 : index
    %c0_23 = arith.constant 0 : index
    %37 = vector.load %arg4[%c0_22, %c0_23] : memref<64x60xbf16, #tpu.memory_space<vmem>>, vector<64x60xbf16>
    %38 = arith.truncf %36 : vector<60x128xf32> to vector<60x128xbf16>
    %cst_24 = arith.constant dense<0.000000e+00> : vector<64x128xf32>
    %39 = tpu.matmul %37, %38, %cst_24 {dimension_numbers = #tpu.dot_dimension_numbers<[1], [0], [0], [1], [0, 0, 1, 1], [], []>} : vector<64x60xbf16>, vector<60x128xbf16>, vector<64x128xf32> -> vector<64x128xf32>
    %40 = vector.extract_strided_slice %39 {offsets = [0, 0], sizes = [32, 128], strides = [1, 1]} : vector<64x128xf32> to vector<32x128xf32>
    %41 = vector.extract_strided_slice %39 {offsets = [32, 0], sizes = [32, 128], strides = [1, 1]} : vector<64x128xf32> to vector<32x128xf32>
    %42 = arith.maximumf %40, %41 : vector<32x128xf32>
    %43 = arith.truncf %42 : vector<32x128xf32> to vector<32x128xbf16>
    %44 = vector.extract_strided_slice %43 {offsets = [0, 0], sizes = [28, 128], strides = [1, 1]} : vector<32x128xbf16> to vector<28x128xbf16>
    %c0_25 = arith.constant 0 : index
    %c0_26 = arith.constant 0 : index
    %c0_27 = arith.constant 0 : index
    %45 = vector.load %arg5[%c0_25, %c0_26, %c0_27] : memref<5x128x160xbf16, #tpu.memory_space<vmem>>, vector<1x128x160xbf16>
    %46 = vector.shape_cast %45 : vector<1x128x160xbf16> to vector<128x160xbf16>
    %cst_28 = arith.constant dense<0.000000e+00> : vector<28x160xf32>
    %47 = tpu.matmul %44, %46, %cst_28 {dimension_numbers = #tpu.dot_dimension_numbers<[1], [0], [0], [1], [0, 0, 1, 1], [], []>} : vector<28x128xbf16>, vector<128x160xbf16>, vector<28x160xf32> -> vector<28x160xf32>
    %48 = vector.extract_strided_slice %43 {offsets = [1, 0], sizes = [28, 128], strides = [1, 1]} : vector<32x128xbf16> to vector<28x128xbf16>
    %c1_29 = arith.constant 1 : index
    %c0_30 = arith.constant 0 : index
    %c0_31 = arith.constant 0 : index
    %49 = vector.load %arg5[%c1_29, %c0_30, %c0_31] : memref<5x128x160xbf16, #tpu.memory_space<vmem>>, vector<1x128x160xbf16>
    %50 = vector.shape_cast %49 : vector<1x128x160xbf16> to vector<128x160xbf16>
    %cst_32 = arith.constant dense<0.000000e+00> : vector<28x160xf32>
    %51 = tpu.matmul %48, %50, %cst_32 {dimension_numbers = #tpu.dot_dimension_numbers<[1], [0], [0], [1], [0, 0, 1, 1], [], []>} : vector<28x128xbf16>, vector<128x160xbf16>, vector<28x160xf32> -> vector<28x160xf32>
    %52 = arith.addf %47, %51 : vector<28x160xf32>
    %53 = vector.extract_strided_slice %43 {offsets = [2, 0], sizes = [28, 128], strides = [1, 1]} : vector<32x128xbf16> to vector<28x128xbf16>
    %c2_33 = arith.constant 2 : index
    %c0_34 = arith.constant 0 : index
    %c0_35 = arith.constant 0 : index
    %54 = vector.load %arg5[%c2_33, %c0_34, %c0_35] : memref<5x128x160xbf16, #tpu.memory_space<vmem>>, vector<1x128x160xbf16>
    %55 = vector.shape_cast %54 : vector<1x128x160xbf16> to vector<128x160xbf16>
    %cst_36 = arith.constant dense<0.000000e+00> : vector<28x160xf32>
    %56 = tpu.matmul %53, %55, %cst_36 {dimension_numbers = #tpu.dot_dimension_numbers<[1], [0], [0], [1], [0, 0, 1, 1], [], []>} : vector<28x128xbf16>, vector<128x160xbf16>, vector<28x160xf32> -> vector<28x160xf32>
    %57 = arith.addf %52, %56 : vector<28x160xf32>
    %58 = vector.extract_strided_slice %43 {offsets = [3, 0], sizes = [28, 128], strides = [1, 1]} : vector<32x128xbf16> to vector<28x128xbf16>
    %c3_37 = arith.constant 3 : index
    %c0_38 = arith.constant 0 : index
    %c0_39 = arith.constant 0 : index
    %59 = vector.load %arg5[%c3_37, %c0_38, %c0_39] : memref<5x128x160xbf16, #tpu.memory_space<vmem>>, vector<1x128x160xbf16>
    %60 = vector.shape_cast %59 : vector<1x128x160xbf16> to vector<128x160xbf16>
    %cst_40 = arith.constant dense<0.000000e+00> : vector<28x160xf32>
    %61 = tpu.matmul %58, %60, %cst_40 {dimension_numbers = #tpu.dot_dimension_numbers<[1], [0], [0], [1], [0, 0, 1, 1], [], []>} : vector<28x128xbf16>, vector<128x160xbf16>, vector<28x160xf32> -> vector<28x160xf32>
    %62 = arith.addf %57, %61 : vector<28x160xf32>
    %63 = vector.extract_strided_slice %43 {offsets = [4, 0], sizes = [28, 128], strides = [1, 1]} : vector<32x128xbf16> to vector<28x128xbf16>
    %c4_41 = arith.constant 4 : index
    %c0_42 = arith.constant 0 : index
    %c0_43 = arith.constant 0 : index
    %64 = vector.load %arg5[%c4_41, %c0_42, %c0_43] : memref<5x128x160xbf16, #tpu.memory_space<vmem>>, vector<1x128x160xbf16>
    %65 = vector.shape_cast %64 : vector<1x128x160xbf16> to vector<128x160xbf16>
    %cst_44 = arith.constant dense<0.000000e+00> : vector<28x160xf32>
    %66 = tpu.matmul %63, %65, %cst_44 {dimension_numbers = #tpu.dot_dimension_numbers<[1], [0], [0], [1], [0, 0, 1, 1], [], []>} : vector<28x128xbf16>, vector<128x160xbf16>, vector<28x160xf32> -> vector<28x160xf32>
    %67 = arith.addf %62, %66 : vector<28x160xf32>
    %c0_45 = arith.constant 0 : index
    %c0_46 = arith.constant 0 : index
    %68 = vector.load %arg6[%c0_45, %c0_46] : memref<1x160xf32, #tpu.memory_space<vmem>>, vector<1x160xf32>
    %69 = vector.broadcast %68 : vector<1x160xf32> to vector<28x160xf32>
    %70 = arith.addf %67, %69 : vector<28x160xf32>
    %cst_47 = arith.constant 0.000000e+00 : f32
    %71 = vector.broadcast %cst_47 : f32 to vector<28x160xf32>
    %72 = arith.maximumf %70, %71 : vector<28x160xf32>
    %73 = arith.truncf %72 : vector<28x160xf32> to vector<28x160xbf16>
    %c0_48 = arith.constant 0 : index
    %c0_49 = arith.constant 0 : index
    %74 = vector.load %arg7[%c0_48, %c0_49] : memref<160x256xbf16, #tpu.memory_space<vmem>>, vector<160x256xbf16>
    %cst_50 = arith.constant dense<0.000000e+00> : vector<28x256xf32>
    %75 = tpu.matmul %73, %74, %cst_50 {dimension_numbers = #tpu.dot_dimension_numbers<[1], [0], [0], [1], [0, 0, 1, 1], [], []>} : vector<28x160xbf16>, vector<160x256xbf16>, vector<28x256xf32> -> vector<28x256xf32>
    %76 = vector.extract_strided_slice %75 {offsets = [0, 0], sizes = [28, 128], strides = [1, 1]} : vector<28x256xf32> to vector<28x128xf32>
    %77 = vector.extract_strided_slice %75 {offsets = [0, 128], sizes = [28, 128], strides = [1, 1]} : vector<28x256xf32> to vector<28x128xf32>
    %78 = arith.maximumf %76, %77 : vector<28x128xf32>
    %c0_51 = arith.constant 0 : index
    %c0_52 = arith.constant 0 : index
    %79 = vector.load %arg8[%c0_51, %c0_52] : memref<32x28xbf16, #tpu.memory_space<vmem>>, vector<32x28xbf16>
    %80 = arith.truncf %78 : vector<28x128xf32> to vector<28x128xbf16>
    %cst_53 = arith.constant dense<0.000000e+00> : vector<32x128xf32>
    %81 = tpu.matmul %79, %80, %cst_53 {dimension_numbers = #tpu.dot_dimension_numbers<[1], [0], [0], [1], [0, 0, 1, 1], [], []>} : vector<32x28xbf16>, vector<28x128xbf16>, vector<32x128xf32> -> vector<32x128xf32>
    %82 = vector.extract_strided_slice %81 {offsets = [0, 0], sizes = [16, 128], strides = [1, 1]} : vector<32x128xf32> to vector<16x128xf32>
    %83 = vector.extract_strided_slice %81 {offsets = [16, 0], sizes = [16, 128], strides = [1, 1]} : vector<32x128xf32> to vector<16x128xf32>
    %84 = arith.maximumf %82, %83 : vector<16x128xf32>
    %85 = arith.truncf %84 : vector<16x128xf32> to vector<16x128xbf16>
    %86 = vector.extract_strided_slice %85 {offsets = [0, 0], sizes = [13, 128], strides = [1, 1]} : vector<16x128xbf16> to vector<13x128xbf16>
    %c0_54 = arith.constant 0 : index
    %c0_55 = arith.constant 0 : index
    %c0_56 = arith.constant 0 : index
    %87 = vector.load %arg9[%c0_54, %c0_55, %c0_56] : memref<4x128x240xbf16, #tpu.memory_space<vmem>>, vector<1x128x240xbf16>
    %88 = vector.shape_cast %87 : vector<1x128x240xbf16> to vector<128x240xbf16>
    %cst_57 = arith.constant dense<0.000000e+00> : vector<13x240xf32>
    %89 = tpu.matmul %86, %88, %cst_57 {dimension_numbers = #tpu.dot_dimension_numbers<[1], [0], [0], [1], [0, 0, 1, 1], [], []>} : vector<13x128xbf16>, vector<128x240xbf16>, vector<13x240xf32> -> vector<13x240xf32>
    %90 = vector.extract_strided_slice %85 {offsets = [1, 0], sizes = [13, 128], strides = [1, 1]} : vector<16x128xbf16> to vector<13x128xbf16>
    %c1_58 = arith.constant 1 : index
    %c0_59 = arith.constant 0 : index
    %c0_60 = arith.constant 0 : index
    %91 = vector.load %arg9[%c1_58, %c0_59, %c0_60] : memref<4x128x240xbf16, #tpu.memory_space<vmem>>, vector<1x128x240xbf16>
    %92 = vector.shape_cast %91 : vector<1x128x240xbf16> to vector<128x240xbf16>
    %cst_61 = arith.constant dense<0.000000e+00> : vector<13x240xf32>
    %93 = tpu.matmul %90, %92, %cst_61 {dimension_numbers = #tpu.dot_dimension_numbers<[1], [0], [0], [1], [0, 0, 1, 1], [], []>} : vector<13x128xbf16>, vector<128x240xbf16>, vector<13x240xf32> -> vector<13x240xf32>
    %94 = arith.addf %89, %93 : vector<13x240xf32>
    %95 = vector.extract_strided_slice %85 {offsets = [2, 0], sizes = [13, 128], strides = [1, 1]} : vector<16x128xbf16> to vector<13x128xbf16>
    %c2_62 = arith.constant 2 : index
    %c0_63 = arith.constant 0 : index
    %c0_64 = arith.constant 0 : index
    %96 = vector.load %arg9[%c2_62, %c0_63, %c0_64] : memref<4x128x240xbf16, #tpu.memory_space<vmem>>, vector<1x128x240xbf16>
    %97 = vector.shape_cast %96 : vector<1x128x240xbf16> to vector<128x240xbf16>
    %cst_65 = arith.constant dense<0.000000e+00> : vector<13x240xf32>
    %98 = tpu.matmul %95, %97, %cst_65 {dimension_numbers = #tpu.dot_dimension_numbers<[1], [0], [0], [1], [0, 0, 1, 1], [], []>} : vector<13x128xbf16>, vector<128x240xbf16>, vector<13x240xf32> -> vector<13x240xf32>
    %99 = arith.addf %94, %98 : vector<13x240xf32>
    %100 = vector.extract_strided_slice %85 {offsets = [3, 0], sizes = [13, 128], strides = [1, 1]} : vector<16x128xbf16> to vector<13x128xbf16>
    %c3_66 = arith.constant 3 : index
    %c0_67 = arith.constant 0 : index
    %c0_68 = arith.constant 0 : index
    %101 = vector.load %arg9[%c3_66, %c0_67, %c0_68] : memref<4x128x240xbf16, #tpu.memory_space<vmem>>, vector<1x128x240xbf16>
    %102 = vector.shape_cast %101 : vector<1x128x240xbf16> to vector<128x240xbf16>
    %cst_69 = arith.constant dense<0.000000e+00> : vector<13x240xf32>
    %103 = tpu.matmul %100, %102, %cst_69 {dimension_numbers = #tpu.dot_dimension_numbers<[1], [0], [0], [1], [0, 0, 1, 1], [], []>} : vector<13x128xbf16>, vector<128x240xbf16>, vector<13x240xf32> -> vector<13x240xf32>
    %104 = arith.addf %99, %103 : vector<13x240xf32>
    %c0_70 = arith.constant 0 : index
    %c0_71 = arith.constant 0 : index
    %105 = vector.load %arg10[%c0_70, %c0_71] : memref<1x240xf32, #tpu.memory_space<vmem>>, vector<1x240xf32>
    %106 = vector.broadcast %105 : vector<1x240xf32> to vector<13x240xf32>
    %107 = arith.addf %104, %106 : vector<13x240xf32>
    %cst_72 = arith.constant 0.000000e+00 : f32
    %108 = vector.broadcast %cst_72 : f32 to vector<13x240xf32>
    %109 = arith.maximumf %107, %108 : vector<13x240xf32>
    %c0_73 = arith.constant 0 : index
    %c0_74 = arith.constant 0 : index
    %110 = vector.load %arg11[%c0_73, %c0_74] : memref<16x13xbf16, #tpu.memory_space<vmem>>, vector<16x13xbf16>
    %111 = arith.truncf %109 : vector<13x240xf32> to vector<13x240xbf16>
    %cst_75 = arith.constant dense<0.000000e+00> : vector<16x240xf32>
    %112 = tpu.matmul %110, %111, %cst_75 {dimension_numbers = #tpu.dot_dimension_numbers<[1], [0], [0], [1], [0, 0, 1, 1], [], []>} : vector<16x13xbf16>, vector<13x240xbf16>, vector<16x240xf32> -> vector<16x240xf32>
    %113 = arith.truncf %112 : vector<16x240xf32> to vector<16x240xbf16>
    %114 = vector.extract_strided_slice %113 {offsets = [0, 0], sizes = [8, 240], strides = [1, 1]} : vector<16x240xbf16> to vector<8x240xbf16>
    %c0_76 = arith.constant 0 : index
    %c0_77 = arith.constant 0 : index
    %c0_78 = arith.constant 0 : index
    %115 = vector.load %arg12[%c0_76, %c0_77, %c0_78] : memref<2x240x84xbf16, #tpu.memory_space<vmem>>, vector<1x240x84xbf16>
    %116 = vector.shape_cast %115 : vector<1x240x84xbf16> to vector<240x84xbf16>
    %cst_79 = arith.constant dense<0.000000e+00> : vector<8x84xf32>
    %117 = tpu.matmul %114, %116, %cst_79 {dimension_numbers = #tpu.dot_dimension_numbers<[1], [0], [0], [1], [0, 0, 1, 1], [], []>} : vector<8x240xbf16>, vector<240x84xbf16>, vector<8x84xf32> -> vector<8x84xf32>
    %118 = vector.extract_strided_slice %113 {offsets = [8, 0], sizes = [8, 240], strides = [1, 1]} : vector<16x240xbf16> to vector<8x240xbf16>
    %c1_80 = arith.constant 1 : index
    %c0_81 = arith.constant 0 : index
    %c0_82 = arith.constant 0 : index
    %119 = vector.load %arg12[%c1_80, %c0_81, %c0_82] : memref<2x240x84xbf16, #tpu.memory_space<vmem>>, vector<1x240x84xbf16>
    %120 = vector.shape_cast %119 : vector<1x240x84xbf16> to vector<240x84xbf16>
    %cst_83 = arith.constant dense<0.000000e+00> : vector<8x84xf32>
    %121 = tpu.matmul %118, %120, %cst_83 {dimension_numbers = #tpu.dot_dimension_numbers<[1], [0], [0], [1], [0, 0, 1, 1], [], []>} : vector<8x240xbf16>, vector<240x84xbf16>, vector<8x84xf32> -> vector<8x84xf32>
    %122 = arith.addf %117, %121 : vector<8x84xf32>
    %c0_84 = arith.constant 0 : index
    %c0_85 = arith.constant 0 : index
    %123 = vector.load %arg13[%c0_84, %c0_85] : memref<1x84xf32, #tpu.memory_space<vmem>>, vector<1x84xf32>
    %124 = vector.broadcast %123 : vector<1x84xf32> to vector<8x84xf32>
    %125 = arith.addf %122, %124 : vector<8x84xf32>
    %cst_86 = arith.constant 0.000000e+00 : f32
    %126 = vector.broadcast %cst_86 : f32 to vector<8x84xf32>
    %127 = arith.maximumf %125, %126 : vector<8x84xf32>
    %128 = arith.truncf %127 : vector<8x84xf32> to vector<8x84xbf16>
    %c0_87 = arith.constant 0 : index
    %c0_88 = arith.constant 0 : index
    %129 = vector.load %arg14[%c0_87, %c0_88] : memref<84x10xbf16, #tpu.memory_space<vmem>>, vector<84x10xbf16>
    %cst_89 = arith.constant dense<0.000000e+00> : vector<8x10xf32>
    %130 = tpu.matmul %128, %129, %cst_89 {dimension_numbers = #tpu.dot_dimension_numbers<[1], [0], [0], [1], [0, 0, 1, 1], [], []>} : vector<8x84xbf16>, vector<84x10xbf16>, vector<8x10xf32> -> vector<8x10xf32>
    %c0_90 = arith.constant 0 : index
    %c0_91 = arith.constant 0 : index
    %131 = vector.load %arg15[%c0_90, %c0_91] : memref<1x10xf32, #tpu.memory_space<vmem>>, vector<1x10xf32>
    %132 = vector.broadcast %131 : vector<1x10xf32> to vector<8x10xf32>
    %133 = arith.addf %130, %132 : vector<8x10xf32>
    %134 = vector.extract_strided_slice %133 {offsets = [0, 0], sizes = [2, 10], strides = [1, 1]} : vector<8x10xf32> to vector<2x10xf32>
    %c0_92 = arith.constant 0 : index
    %c0_93 = arith.constant 0 : index
    %135 = vector.load %arg16[%c0_92, %c0_93] : memref<2x10xf32, #tpu.memory_space<vmem>>, vector<2x10xf32>
    tpu.vector_store %arg16[%c0_92, %c0_93], %134 {strides = array<i32>} : memref<2x10xf32, #tpu.memory_space<vmem>>, vector<2x10xf32>,
    return
  }
}

</mosaic_0001>

<bundles_post_ra>
// kernel: lenet_forward.1
= control target key start
LH: loop header
LB: loop body
LE: loop exit
PB: predicated region body
PF: predicated region fallthrough
CT: control target
= control target key end

     0   :  { %s5978_s0 = inlined_call_operand.vmem [shape: f32[64,96], index: 0, kind: input, shape index: {}]   ;;  %s5979_s1 = inlined_call_operand.vmem [shape: bf16[5,96,168], index: 1, kind: input, shape index: {}]   ;;  %s5980_s2 = inlined_call_operand.vmem [shape: f32[1,168], index: 2, kind: input, shape index: {}]   ;;  %s5981_s3 = inlined_call_operand.vmem [shape: bf16[168,256], index: 3, kind: input, shape index: {}]   ;;  %s5982_s4 = inlined_call_operand.vmem [shape: bf16[64,60], index: 4, kind: input, shape index: {}]   ;;  %s5983_s5 = inlined_call_operand.vmem [shape: bf16[5,128,160], index: 5, kind: input, shape index: {}]   ;;  %s5984_s6 = inlined_call_operand.vmem [shape: f32[1,160], index: 6, kind: input, shape index: {}]   ;;  %s5985_s7 = inlined_call_operand.vmem [shape: bf16[160,256], index: 7, kind: input, shape index: {}]   ;;  %s5986_s8 = inlined_call_operand.vmem [shape: bf16[32,28], index: 8, kind: input, shape index: {}]   ;;  %s5987_s9 = inlined_call_operand.vmem [shape: bf16[4,128,240], index: 9, kind: input, shape index: {}]   ;;  %s5988_s10 = inlined_call_operand.vmem [shape: f32[1,240], index: 10, kind: input, shape index: {}]   ;;  %s5989_s11 = inlined_call_operand.vmem [shape: bf16[16,13], index: 11, kind: input, shape index: {}]   ;;  %s5990_s12 = inlined_call_operand.vmem [shape: bf16[2,240,84], index: 12, kind: input, shape index: {}]   ;;  %s5991_s13 = inlined_call_operand.vmem [shape: f32[1,84], index: 13, kind: input, shape index: {}]   ;;  %s5992_s14 = inlined_call_operand.vmem [shape: bf16[84,10], index: 14, kind: input, shape index: {}]   ;;  %s5993_s15 = inlined_call_operand.vmem [shape: f32[1,10], index: 15, kind: input, shape index: {}]   ;;  %s5994_s16 = inlined_call_operand.hbm [shape: f32[2,10], index: 16, kind: output, shape index: {}]  }
   0x1   :  { %5996 = sst [smem:[#allocation5_spill]] %s5978_s0 }
   0x2   :  { %v4292_v0 = vld [vmem:[%s5979_s1 + $0x64] ss:$8 sps:$4 sm:$0xff]   ;;  %v4294_v1 = vld [vmem:[%s5979_s1 + $0x60] ss:$8 sps:$4 sm:$0xff]   ;;  %v4727_v2 = vmov 0   ;;  %s5997_s22 = sld [smem:[#allocation5_spill]] }
   0x3   :  { %229 = vmatprep.mubr.bf16.mxu0 %v4727_v2  ;;  %197 = vmatprep.subr.bf16.mxu0 %v4292_v0  ;;  %v4295_v3 = vld [vmem:[%s5979_s1 + $0x74] ss:$8 sps:$4 sm:$0xff]   ;;  %v4297_v4 = vld [vmem:[%s5979_s1 + $0x70] ss:$8 sps:$4 sm:$0xff]   ;;  %v4298_v5 = vld [vmem:[%s5979_s1 + $0x84] ss:$8 sps:$4 sm:$0xff]  }
   0x4   :  { %198 = vmatpush1.bf16.msra.mxu0 %v4294_v1  ;;  %v4300_v6 = vld [vmem:[%s5979_s1 + $0x80] ss:$8 sps:$4 sm:$0xff]   ;;  %v4301_v7 = vld [vmem:[%s5979_s1 + $0x94] ss:$8 sps:$4 sm:$0xff]   ;;  %v4303_v13 = vld [vmem:[%s5979_s1 + $0x90] ss:$8 sps:$4 sm:$0xff]  }
   0x5   :  { %199 = vmatprep.subr.bf16.mxu0 %v4295_v3  ;;  %v4304_v19 = vld [vmem:[%s5979_s1 + $0xa4] ss:$8 sps:$4 sm:$0xff]   ;;  %vm428_vm0 = vcmask 1046528   ;;  %v4306_v30 = vld [vmem:[%s5979_s1 + $0xa0] ss:$8 sps:$4 sm:$0xff]   ;;  %vm184_vm3 = vcmask 785408  }
   0x6   :  { %v4307_v34 = vld [vmem:[%s5979_s1 + $0xb4] ss:$8 sps:$4 sm:$0xff]   ;;  %vm610_vm1 = vsmask.f32 6400  ;;  %v4309_v44 = vld [vmem:[%s5979_s1 + $0xb0] ss:$8 sps:$4 sm:$0xff]  }
   0x7   :  { %vm92_vm2 = vsmask.f32 7424  ;;  %v4312_v49 = vld [vmem:[%s5979_s1 + $0x4] ss:$8 sps:$4 sm:$0xff]   ;;  %v4310_v56 = vld [vmem:[%s5979_s1] ss:$8 sps:$4 sm:$0xff]  }
   0x8   :  { %200 = vmatpush1.bf16.msra.mxu0 %v4297_v4  ;;  %v55_v8 = vld [vmem:[%s5997_s22] sm:$0xff]  ;;  %v56_v9 = vld [vmem:[%s5997_s22 + $0x8] sm:$0xff]  ;;  %v57_v10 = vld [vmem:[%s5997_s22 + $0x10] sm:$0xff]  ;;  %vm800_vm4 = vcmask 1045504  }
   0x9   :  { %201 = vmatprep.subr.bf16.mxu0 %v4298_v5  ;;  %v58_v11 = vld [vmem:[%s5997_s22 + $0x18] sm:$0xff]  ;;  %v4851_v12 = vpack.c.bf16 %v56_v9, %v55_v8  ;;  %v59_v15 = vld [vmem:[%s5997_s22 + $0x20] sm:$0xff]  ;;  %v60_v18 = vld [vmem:[%s5997_s22 + $0x28] sm:$0xff] }
   0xa   :  { %v4856_v14 = vpack.c.bf16 %v58_v11, %v57_v10  ;;  %v61_v24 = vld [vmem:[%s5997_s22 + $0x30] sm:$0xff]  ;;  %v4875_v28 = vpack.c.bf16 %v60_v18, %v59_v15  ;;  %v62_v31 = vld [vmem:[%s5997_s22 + $0x38] sm:$0xff]  ;;  %v4316_v9 = vld [vmem:[%s5979_s1 + $0x20] ss:$8 sps:$4 sm:$0xff]  }
   0xb   :  { %v94_v16 = vshrl.u32 %v4851_v12, 16  ;;  %v96_v17 = vshll.u32 %v4851_v12, 16  ;;  %v429_v25 = vrot.slane %v4851_v12, 1  ;;  %v4887_v35 = vpack.c.bf16 %v62_v31, %v61_v24  ;;  %v4315_v59 = vld [vmem:[%s5979_s1 + $0x14] ss:$8 sps:$4 sm:$0xff]  }
   0xc   :  { %202 = vmatpush1.bf16.msra.mxu0 %v4300_v6  ;;  %v101_v20 = vshll.u32 %v4856_v14, 16  ;;  %v105_v21 = vshrl.u32 %v4856_v14, 16  ;;  %v430_v32 = vrot.slane %v4856_v14, 1  ;;  %v113_v36 = vshrl.u32 %v4875_v28, 16  ;;  %v4313_v4 = vld [vmem:[%s5979_s1 + $0x10] ss:$8 sps:$4 sm:$0xff]  }
   0xd   :  { %203 = vmatprep.subr.bf16.mxu0 %v4301_v7  ;;  %v611_v22 = vrot.slane %v94_v16, 1  ;;  %v612_v23 = vrot.slane %v96_v17, 2  ;;  %v98_v26 = vrot.slane %v96_v17, 1  ;;  %v432_v39 = vrot.slane %v4875_v28, 1  ;;  %v4318_v6 = vld [vmem:[%s5979_s1 + $0x24] ss:$8 sps:$4 sm:$0xff]  }
   0xe   :  { %v615_v27 = vrot.slane %v101_v20, 2  ;;  %v614_v29 = vrot.slane %v105_v21, 1  ;;  %v4891_v38 = vsel %vm428_vm0, %v429_v25, %v430_v32  ;;  %v103_v41 = vrot.slane %v101_v20, 1  ;;  %v4321_v10 = vld [vmem:[%s5979_s1 + $0x34] ss:$8 sps:$4 sm:$0xff]  }
   0xf   :  { %v613_v33 = vor.u32 %v612_v23, %v611_v22  ;;  %v99_v40 = vor.u32 %v98_v26, %v94_v16  ;;  %v109_v42 = vshll.u32 %v4875_v28, 16  ;;  %v618_v43 = vrot.slane %v113_v36, 1  ;;  %v4319_v15 = vld [vmem:[%s5979_s1 + $0x30] ss:$8 sps:$4 sm:$0xff]   ;;  %v4324_v17 = vld [vmem:[%s5979_s1 + $0x44] ss:$8 sps:$4 sm:$0xff]  }
  0x10   :  { %204 = vmatpush1.bf16.msra.mxu0 %v4303_v13  ;;  %v616_v37 = vor.u32 %v615_v27, %v614_v29  ;;  %v121_v45 = vshrl.u32 %v4887_v35, 16  ;;  %v4900_v46 = vsel %vm428_vm0, %v430_v32, %v432_v39  ;;  %v434_v47 = vrot.slane %v4887_v35, 1  ;;  %v4322_v20 = vld [vmem:[%s5979_s1 + $0x40] ss:$8 sps:$4 sm:$0xff]   ;;  %v4325_v22 = vld [vmem:[%s5979_s1 + $0x50] ss:$8 sps:$4 sm:$0xff]  }
  0x11   :  { %205 = vmatprep.subr.bf16.mxu0 %v4304_v19  ;;  %v117_v50 = vshll.u32 %v4887_v35, 16  ;;  %v619_v52 = vrot.slane %v109_v42, 2  ;;  %v104_v55 = vsel %vm92_vm2, %v99_v40, %v103_v41  ;;  %v801_v58 = vrot.slane %v4851_v12, 2  ;;  %v4330_v23 = vld [vmem:[%s5979_s1 + $0xc4] ss:$8 sps:$4 sm:$0xff]  }
  0x12   :  { %v4904_v48 = vsel %vm610_vm1, %v613_v33, %v616_v37  ;;  %v4913_v51 = vsel %vm428_vm0, %v432_v39, %v434_v47  ;;  %v622_v53 = vrot.slane %v121_v45, 1  ;;  %v802_v61 = vrot.slane %v4856_v14, 2  ;;  %v4382_v25 = vld [vmem:[%s5981_s3 + $0x4] ss:$8 sps:$4 sm:$0xff]   ;;  %v4384_v26 = vld [vmem:[%s5981_s3] ss:$8 sps:$4 sm:$0xff]  }
  0x13   :  { %v623_v54 = vrot.slane %v117_v50, 2  ;;  %v620_v57 = vor.u32 %v619_v52, %v618_v43  ;;  %v107_v1 = vor.u32 %v105_v21, %v103_v41  ;;  %v111_v3 = vrot.slane %v109_v42, 1  ;;  %v4327_v21 = vld [vmem:[%s5979_s1 + $0x54] ss:$8 sps:$4 sm:$0xff]   ;;  %1167 = vmatprep.subr.bf16.mxu1 %v4382_v25  ;;  %v4387_v29 = vld [vmem:[%s5981_s3 + $0x10] ss:$8 sps:$4 sm:$0xff]  }
  0x14   :  { %206 = vmatpush1.bf16.msra.mxu0 %v4306_v30  ;;  %v4935_v0 = vsel %vm800_vm4, %v801_v58, %v802_v61  ;;  %v804_v5 = vrot.slane %v4875_v28, 2  ;;  %v119_v13 = vrot.slane %v117_v50, 1  ;;  %v806_v16 = vrot.slane %v4887_v35, 2  ;;  %v4385_v27 = vld [vmem:[%s5981_s3 + $0x14] ss:$8 sps:$4 sm:$0xff]   ;;  %1168 = vmatpush1.bf16.msra.mxu1 %v4384_v26 }
  0x15   :  { %207 = vmatprep.subr.bf16.mxu0 %v4307_v34  ;;  %v4923_v60 = vor.u32 %v623_v54, %v622_v53  ;;  %v4927_v62 = vsel %vm610_vm1, %v616_v37, %v620_v57  ;;  %v112_v8 = vsel %vm92_vm2, %v107_v1, %v111_v3  ;;  %v115_v11 = vor.u32 %v113_v36, %v111_v3  ;;  %v4328_v30 = vld [vmem:[%s5979_s1 + $0xc0] ss:$8 sps:$4 sm:$0xff]   ;;  %v4388_v31 = vld [vmem:[%s5981_s3 + $0x24] ss:$8 sps:$4 sm:$0xff]   ;;  %v4333_v32 = vld [vmem:[%s5979_s1 + $0xd4] ss:$8 sps:$4 sm:$0xff]  }
  0x16   :  { %v4946_v7 = vsel %vm800_vm4, %v802_v61, %v804_v5  ;;  %v4967_v18 = vsel %vm800_vm4, %v804_v5, %v806_v16  ;;  %v123_v24 = vor.u32 %v121_v45, %v119_v13  ;;  %1169 = vmatprep.subr.bf16.mxu1 %v4385_v27  ;;  %v4390_v33 = vld [vmem:[%s5981_s3 + $0x20] ss:$8 sps:$4 sm:$0xff]   ;;  %v4391_v34 = vld [vmem:[%s5981_s3 + $0x34] ss:$8 sps:$4 sm:$0xff]   ;;  %v4331_v36 = vld [vmem:[%s5979_s1 + $0xd0] ss:$8 sps:$4 sm:$0xff]  }
  0x17   :  { %v4932_v63 = vsel %vm610_vm1, %v620_v57, %v4923_v60  ;;  %v120_v19 = vsel %vm92_vm2, %v115_v11, %v119_v13  ;;  %v4336_v37 = vld [vmem:[%s5979_s1 + $0xe4] ss:$8 sps:$4 sm:$0xff]   ;;  %v4393_v39 = vld [vmem:[%s5981_s3 + $0x30] ss:$8 sps:$4 sm:$0xff]   ;;  %v4339_v41 = vld [vmem:[%s5979_s1 + $0xf4] ss:$8 sps:$4 sm:$0xff]  }
  0x18   :  { %208 = vmatpush1.bf16.msra.mxu0 %v4309_v44  ;;  %1170 = vmatpush1.bf16.msra.mxu1 %v4387_v29  ;;  %v4394_v40 = vld [vmem:[%s5981_s3 + $0x44] ss:$8 sps:$4 sm:$0xff]   ;;  %v4396_v42 = vld [vmem:[%s5981_s3 + $0x40] ss:$8 sps:$4 sm:$0xff]   ;;  %v4397_v43 = vld [vmem:[%s5981_s3 + $0x54] ss:$8 sps:$4 sm:$0xff]  }
  0x19   :  { %338 = vmatprep.subr.bf16.mxu0 %v4312_v49  ;;  %1171 = vmatprep.subr.bf16.mxu1 %v4388_v31  ;;  %v4337_v44 = vld [vmem:[%s5979_s1 + $0xf0] ss:$8 sps:$4 sm:$0xff]   ;;  %v4342_v45 = vld [vmem:[%s5979_s1 + $0x104] ss:$8 sps:$4 sm:$0xff]   ;;  %v4345_v52 = vld [vmem:[%s5979_s1 + $0x114] ss:$8 sps:$4 sm:$0xff]  }
  0x1a   :  { %v4399_v49 = vld [vmem:[%s5981_s3 + $0x50] ss:$8 sps:$4 sm:$0xff]   ;;  %v4400_v50 = vld [vmem:[%s5981_s3 + $0x64] ss:$8 sps:$4 sm:$0xff]   ;;  %v4402_v53 = vld [vmem:[%s5981_s3 + $0x60] ss:$8 sps:$4 sm:$0xff]  }
  0x1b   :  { %3624 = vmatmul.mubr.msk.bf16.vlgmr.msra.gmra.mrb[0].mxu0 %vm184_vm3, %v104_v55  ;;  %v4403_v54 = vld [vmem:[%s5981_s3 + $0x74] ss:$8 sps:$4 sm:$0xff]   ;;  %v4343_v55 = vld [vmem:[%s5979_s1 + $0x110] ss:$8 sps:$4 sm:$0xff]   ;;  %v4406_v58 = vld [vmem:[%s5981_s3 + $0x84] ss:$8 sps:$4 sm:$0xff]  }
  0x1c   :  { %339 = vmatpush1.bf16.msra.mxu0 %v4310_v56  ;;  %239 = vmatprep.mubr.bf16.mxu0 %v4727_v2  ;;  %v4348_v56 = vld [vmem:[%s5979_s1 + $0x124] ss:$8 sps:$4 sm:$0xff]   ;;  %v4405_v57 = vld [vmem:[%s5981_s3 + $0x70] ss:$8 sps:$4 sm:$0xff]   ;;  %v4352_v3 = vld [vmem:[%s5979_s1 + $0x140] ss:$8 sps:$4 sm:$0xff]  }
  0x1d   :  { %340 = vmatprep.subr.bf16.mxu0 %v4315_v59  ;;  %1172 = vmatpush1.bf16.msra.mxu1 %v4390_v33  ;;  %v4351_v59 = vld [vmem:[%s5979_s1 + $0x134] ss:$8 sps:$4 sm:$0xff]   ;;  %v4349_v61 = vld [vmem:[%s5979_s1 + $0x130] ss:$8 sps:$4 sm:$0xff]   ;;  %v4354_v1 = vld [vmem:[%s5979_s1 + $0x144] ss:$8 sps:$4 sm:$0xff]  }
  0x1e   :  { %1173 = vmatprep.subr.bf16.mxu1 %v4391_v34  ;;  %v4360_v5 = vld [vmem:[%s5979_s1 + $0x164] ss:$8 sps:$4 sm:$0xff]   ;;  %v4367_v11 = vld [vmem:[%s5979_s1 + $0x190] ss:$8 sps:$4 sm:$0xff]   ;;  %v4370_v13 = vld [vmem:[%s5979_s1 + $0x1a0] ss:$8 sps:$4 sm:$0xff]  }
  0x20   :  { %341 = vmatpush1.bf16.msra.mxu0 %v4313_v4  ;;  %v4357_v4 = vld [vmem:[%s5979_s1 + $0x154] ss:$8 sps:$4 sm:$0xff]  }
  0x21   :  { %342 = vmatprep.subr.bf16.mxu0 %v4318_v6  ;;  %1174 = vmatpush1.bf16.msra.mxu1 %v4393_v39  ;;  %v4358_v6 = vld [vmem:[%s5979_s1 + $0x160] ss:$8 sps:$4 sm:$0xff]  }
  0x22   :  { %1175 = vmatprep.subr.bf16.mxu1 %v4394_v40 }
  0x23   :  { %3625 = vmatmul.mubr.msk.bf16.gmra.mrb[4].mxu0 %vm184_vm3, %v112_v8  ;;  %v4363_v8 = vld [vmem:[%s5979_s1 + $0x174] ss:$8 sps:$4 sm:$0xff]  }
  0x24   :  { %249 = vmatprep.mubr.bf16.mxu0 %v4727_v2  ;;  %343 = vmatpush1.bf16.msra.mxu0 %v4316_v9  ;;  %v4366_v9 = vld [vmem:[%s5979_s1 + $0x184] ss:$8 sps:$4 sm:$0xff]  }
  0x25   :  { %344 = vmatprep.subr.bf16.mxu0 %v4321_v10  ;;  %1176 = vmatpush1.bf16.msra.mxu1 %v4396_v42  ;;  %v4369_v10 = vld [vmem:[%s5979_s1 + $0x194] ss:$8 sps:$4 sm:$0xff]  }
  0x26   :  { %1177 = vmatprep.subr.bf16.mxu1 %v4397_v43 }
  0x28   :  { %345 = vmatpush1.bf16.msra.mxu0 %v4319_v15  ;;  %v4375_v15 = vld [vmem:[%s5979_s1 + $0x1b4] ss:$8 sps:$4 sm:$0xff]  }
  0x29   :  { %346 = vmatprep.subr.bf16.mxu0 %v4324_v17  ;;  %1178 = vmatpush1.bf16.msra.mxu1 %v4399_v49  ;;  %v4378_v17 = vld [vmem:[%s5979_s1 + $0x1c4] ss:$8 sps:$4 sm:$0xff]  }
  0x2a   :  { %1179 = vmatprep.subr.bf16.mxu1 %v4400_v50 }
  0x2b   :  { %3626 = vmatmul.mubr.msk.bf16.gmra.mrb[8].mxu0 %vm184_vm3, %v120_v19  ;;  %v4376_v19 = vld [vmem:[%s5979_s1 + $0x1c0] ss:$8 sps:$4 sm:$0xff]  }
  0x2c   :  { %259 = vmatprep.mubr.bf16.mxu0 %v4727_v2  ;;  %347 = vmatpush1.bf16.msra.mxu0 %v4322_v20  ;;  %v4381_v20 = vld [vmem:[%s5979_s1 + $0x1d4] ss:$8 sps:$4 sm:$0xff]  }
  0x2d   :  { %348 = vmatprep.subr.bf16.mxu0 %v4327_v21  ;;  %1180 = vmatpush1.bf16.msra.mxu1 %v4402_v53 }
  0x2e   :  { %1181 = vmatprep.subr.bf16.mxu1 %v4403_v54 }
  0x30   :  { %349 = vmatpush1.bf16.msra.mxu0 %v4325_v22 }
  0x31   :  { %508 = vmatprep.subr.bf16.mxu0 %v4330_v23  ;;  %1182 = vmatpush1.bf16.msra.mxu1 %v4405_v57 }
  0x32   :  { %1183 = vmatprep.subr.bf16.mxu1 %v4406_v58 }
  0x33   :  { %3627 = vmatmul.mubr.msk.bf16.gmra.mrb[12].mxu0 %vm184_vm3, %v123_v24 }
  0x34   :  { %370 = vmatprep.mubr.bf16.mxu0 %v4727_v2 }
  0x3b   :  { %3640 = vmatmul.mubr.msk.bf16.vlgmr.msra.gmra.mrb[0].mxu0 %vm184_vm3, %v4851_v12  ;;  %v4334_v12 = vld [vmem:[%s5979_s1 + $0xe0] ss:$8 sps:$4 sm:$0xff]  }
  0x3c   :  { %509 = vmatpush1.bf16.msra.mxu0 %v4328_v30  ;;  %380 = vmatprep.mubr.bf16.mxu0 %v4727_v2 }
  0x3d   :  { %510 = vmatprep.subr.bf16.mxu0 %v4333_v32 }
  0x40   :  { %511 = vmatpush1.bf16.msra.mxu0 %v4331_v36 }
  0x41   :  { %512 = vmatprep.subr.bf16.mxu0 %v4336_v37 }
  0x43   :  { %3641 = vmatmul.mubr.msk.bf16.gmra.mrb[4].mxu0 %vm184_vm3, %v4856_v14  ;;  %v4340_v14 = vld [vmem:[%s5979_s1 + $0x100] ss:$8 sps:$4 sm:$0xff]  }
  0x44   :  { %390 = vmatprep.mubr.bf16.mxu0 %v4727_v2  ;;  %513 = vmatpush1.bf16.msra.mxu0 %v4334_v12 }
  0x45   :  { %514 = vmatprep.subr.bf16.mxu0 %v4339_v41 }
  0x48   :  { %515 = vmatpush1.bf16.msra.mxu0 %v4337_v44 }
  0x49   :  { %516 = vmatprep.subr.bf16.mxu0 %v4342_v45 }
  0x4b   :  { %3642 = vmatmul.mubr.msk.bf16.gmra.mrb[8].mxu0 %vm184_vm3, %v4875_v28  ;;  %v4346_v28 = vld [vmem:[%s5979_s1 + $0x120] ss:$8 sps:$4 sm:$0xff]  }
  0x4c   :  { %400 = vmatprep.mubr.bf16.mxu0 %v4727_v2  ;;  %517 = vmatpush1.bf16.msra.mxu0 %v4340_v14 }
  0x4d   :  { %518 = vmatprep.subr.bf16.mxu0 %v4345_v52 }
  0x50   :  { %519 = vmatpush1.bf16.msra.mxu0 %v4343_v55 }
  0x51   :  { %698 = vmatprep.subr.bf16.mxu0 %v4348_v56 }
  0x53   :  { %3643 = vmatmul.mubr.msk.bf16.gmra.mrb[12].mxu0 %vm184_vm3, %v4887_v35 }
  0x54   :  { %540 = vmatprep.mubr.bf16.mxu0 %v4727_v2 }
  0x5b   :  { %3668 = vmatmul.mubr.msk.bf16.vlgmr.msra.gmra.mrb[0].mxu0 %vm184_vm3, %v4891_v38  ;;  %v4355_v38 = vld [vmem:[%s5979_s1 + $0x150] ss:$8 sps:$4 sm:$0xff]  }
  0x5c   :  { %699 = vmatpush1.bf16.msra.mxu0 %v4346_v28  ;;  %550 = vmatprep.mubr.bf16.mxu0 %v4727_v2 }
  0x5d   :  { %700 = vmatprep.subr.bf16.mxu0 %v4351_v59 }
  0x60   :  { %701 = vmatpush1.bf16.msra.mxu0 %v4349_v61 }
  0x61   :  { %702 = vmatprep.subr.bf16.mxu0 %v4354_v1 }
  0x63   :  { %3669 = vmatmul.mubr.msk.bf16.gmra.mrb[4].mxu0 %vm184_vm3, %v4900_v46  ;;  %v4361_v46 = vld [vmem:[%s5979_s1 + $0x170] ss:$8 sps:$4 sm:$0xff]  }
  0x64   :  { %560 = vmatprep.mubr.bf16.mxu0 %v4727_v2  ;;  %703 = vmatpush1.bf16.msra.mxu0 %v4352_v3 }
  0x65   :  { %704 = vmatprep.subr.bf16.mxu0 %v4357_v4 }
  0x68   :  { %705 = vmatpush1.bf16.msra.mxu0 %v4355_v38 }
  0x69   :  { %706 = vmatprep.subr.bf16.mxu0 %v4360_v5 }
  0x6b   :  { %3670 = vmatmul.mubr.msk.bf16.gmra.mrb[8].mxu0 %vm184_vm3, %v4913_v51  ;;  %v4364_v51 = vld [vmem:[%s5979_s1 + $0x180] ss:$8 sps:$4 sm:$0xff]  }
  0x6c   :  { %570 = vmatprep.mubr.bf16.mxu0 %v4727_v2  ;;  %707 = vmatpush1.bf16.msra.mxu0 %v4358_v6 }
  0x6d   :  { %708 = vmatprep.subr.bf16.mxu0 %v4363_v8 }
  0x70   :  { %709 = vmatpush1.bf16.msra.mxu0 %v4361_v46 }
  0x71   :  { %880 = vmatprep.subr.bf16.mxu0 %v4366_v9 }
  0x73   :  { %3671 = vmatmul.mubr.msk.bf16.gmra.mrb[12].mxu0 %vm184_vm3, %v434_v47  ;;  %v4372_v47 = vld [vmem:[%s5979_s1 + $0x1a4] ss:$8 sps:$4 sm:$0xff]  }
  0x74   :  { %730 = vmatprep.mubr.bf16.mxu0 %v4727_v2 }
  0x7b   :  { %3696 = vmatmul.mubr.msk.bf16.vlgmr.msra.gmra.mrb[0].mxu0 %vm184_vm3, %v4904_v48  ;;  %v4373_v48 = vld [vmem:[%s5979_s1 + $0x1b0] ss:$8 sps:$4 sm:$0xff]  }
  0x7c   :  { %881 = vmatpush1.bf16.msra.mxu0 %v4364_v51  ;;  %740 = vmatprep.mubr.bf16.mxu0 %v4727_v2 }
  0x7d   :  { %882 = vmatprep.subr.bf16.mxu0 %v4369_v10 }
  0x80   :  { %883 = vmatpush1.bf16.msra.mxu0 %v4367_v11 }
  0x81   :  { %884 = vmatprep.subr.bf16.mxu0 %v4372_v47 }
  0x83   :  { %3697 = vmatmul.mubr.msk.bf16.gmra.mrb[4].mxu0 %vm184_vm3, %v4927_v62  ;;  %v4379_v62 = vld [vmem:[%s5979_s1 + $0x1d0] ss:$8 sps:$4 sm:$0xff]  }
  0x84   :  { %750 = vmatprep.mubr.bf16.mxu0 %v4727_v2  ;;  %885 = vmatpush1.bf16.msra.mxu0 %v4370_v13 }
  0x85   :  { %886 = vmatprep.subr.bf16.mxu0 %v4375_v15 }
  0x88   :  { %887 = vmatpush1.bf16.msra.mxu0 %v4373_v48 }
  0x89   :  { %888 = vmatprep.subr.bf16.mxu0 %v4378_v17 }
  0x8b   :  { %3698 = vmatmul.mubr.msk.bf16.gmra.mrb[8].mxu0 %vm184_vm3, %v4932_v63 }
  0x8c   :  { %760 = vmatprep.mubr.bf16.mxu0 %v4727_v2  ;;  %889 = vmatpush1.bf16.msra.mxu0 %v4376_v19 }
  0x8d   :  { %21 = vsyncpa [#allocation3], 0  ;;  %890 = vmatprep.subr.bf16.mxu0 %v4381_v20  ;;  %v4409_v63 = vld [vmem:[%s5981_s3 + $0x94] ss:$8 sps:$4 sm:$0xff]   ;;  %v1041_v35 = vld [vmem:[%s5981_s3 + $0xa0] sm:$0xff]  ;;  %vm1160_vm5 = vcmask 1043456   ;;  %v971_v21 = vlaneseq }
  0x8e   :  { %v969_v24 = vld [vmem:[%s5980_s2] sm:$0x3]  ;;  %vm1147_vm6 = vcmask 326656   ;;  %vm1280_vm7 = vcmask 490496   ;;  %vm2331_vm8 = vcmask 261120   ;;  %vm2411_vm9 = vcmask 228352  }
  0x8f   :  { %v972_v22 = vshrl.u32 %v971_v21, 7  ;;  %v4414_v21 = vld [vmem:[%s5982_s4] sm:$0xff]   ;;  %vm3084_vm10 = vcmask 105472   ;;  %vm3298_vm11 = vcmask 916480   ;;  %vm3540_vm12 = vcmask 1041408   ;;  %s4731_s18 = smov [#allocation2]  }
  0x90   :  { %891 = vmatpush1.bf16.msra.mxu0 %v4379_v62  ;;  %vm4730_vm13 = vmmov 0   ;;  %vm3536_vm14 = vcmask 687104   ;;  %s3592_s19 = sshll.u32 %s4731_s18, 4  ;;  %vm3584_vm15 = vcmask 74752   ;;  %s3593_s19 = int_to_ptr.vmem [resolvable:$true] %s3592_s19 }
  0x91   :  { %v5203_v23 = vsub.s32 0, %v972_v22  ;;  %v5208_v25 = vsub.s32 1, %v972_v22  ;;  %p4708_p1 = scmp.lt.s32.totalorder %s3593_s19, %s3593_s19 }
  0x93   :  { %3699 = vmatmul.mubr.msk.bf16.gmra.mrb[12].mxu0 %vm184_vm3, %v4923_v60  ;;  %v4408_v60 = vld [vmem:[%s5981_s3 + $0x80] ss:$8 sps:$4 sm:$0xff]   ;;  %v974_v26 = vrot.slane %v969_v24, %v5203_v23  ;;  %v978_v27 = vrot.slane %v969_v24, %v5208_v25 }
  0x94   :  { %912 = vmatprep.mubr.bf16.mxu0 %v4727_v2  ;;  %1184 = vmatpush1.bf16.msra.mxu1 %v4408_v60 }
  0x95   :  { %1185 = vmatprep.subr.bf16.mxu1 %v4409_v63 }
  0x9b   :  { %3724 = vmatmul.mubr.msk.bf16.vlgmr.msra.gmra.mrb[0].mxu0 %vm184_vm3, %v4935_v0  ;;  %v4411_v0 = vld [vmem:[%s5981_s3 + $0x90] ss:$8 sps:$4 sm:$0xff]  }
  0x9c   :  { %922 = vmatprep.mubr.bf16.mxu0 %v4727_v2  ;;  %1186 = vmatpush1.bf16.msra.mxu1 %v4411_v0 }
  0xa3   :  { %3725 = vmatmul.mubr.msk.bf16.gmra.mrb[4].mxu0 %vm184_vm3, %v4946_v7  ;;  %v3749_v7 = vcombine.high %v1041_v35, %v1041_v35 }
  0xa4   :  { %932 = vmatprep.mubr.bf16.mxu0 %v4727_v2 }
  0xa5   :  { %3750 = vmatprep.subr.msk.bf16.mxu1 %vm1160_vm5, %v3749_v7 }
  0xab   :  { %3726 = vmatmul.mubr.msk.bf16.gmra.mrb[8].mxu0 %vm184_vm3, %v4967_v18 }
  0xac   :  { %942 = vmatprep.mubr.bf16.mxu0 %v4727_v2 }
  0xb3   :  { %3727 = vmatmul.mubr.msk.bf16.gmra.mrb[12].mxu0 %vm184_vm3, %v806_v16  ;;  %v3748_v16 = vcombine.low %v1041_v35, %v1041_v35 }
  0xb5   :  { %v1162_v18 = vsel %vm1160_vm5, %v3748_v16, 0 }
  0xb6   :  { %1188 = vmatpush1.bf16.msra.mxu1 %v1162_v18 }
 0x16e   :  { %v914_v29 = vpop.f32.mrb[0].mxu0 }
 0x16f   :  { %v981_v30 = vadd.f32 %v974_v26, %v914_v29  ;;  %v916_v31 = vpop.f32.mrb[1].mxu0 }
 0x170   :  { %v982_v32 = vadd.f32 %v978_v27, %v916_v31  ;;  %v918_v33 = vpop.f32.mrb[2].mxu0 }
 0x171   :  { %v983_v34 = vadd.f32 %v974_v26, %v918_v33  ;;  %v920_v36 = vpop.f32.mrb[3].mxu0  ;;  %v997_v39 = vmax.f32 %v981_v30, 0.0 }
 0x172   :  { %v984_v37 = vadd.f32 %v978_v27, %v920_v36  ;;  %v998_v12 = vmax.f32 %v982_v32, 0.0 }
 0x173   :  { %v999_v40 = vmax.f32 %v983_v34, 0.0 }
 0x174   :  { %v1000_v41 = vmax.f32 %v984_v37, 0.0 }
 0x175   :  { %v1013_v42 = vpack.c.bf16 %v999_v40, %v997_v39 }
 0x176   :  { %v924_v43 = vpop.f32.mrb[4].mxu0  ;;  %v1014_v44 = vpack.c.bf16 %v1000_v41, %v998_v12 }
 0x177   :  { %v985_v45 = vadd.f32 %v974_v26, %v924_v43  ;;  %v926_v49 = vpop.f32.mrb[5].mxu0 }
 0x178   :  { %v986_v50 = vadd.f32 %v978_v27, %v926_v49  ;;  %v928_v14 = vpop.f32.mrb[6].mxu0  ;;  %3751 = vmatprep.mubr.msk.bf16.mxu1 %vm1147_vm6, %v1014_v44 }
 0x179   :  { %v987_v52 = vadd.f32 %v974_v26, %v928_v14  ;;  %v930_v53 = vpop.f32.mrb[7].mxu0  ;;  %1200 = vmatmul.mubr.bf16.vlgmr.msra.gmra.mrb[0].mxu1 %v1013_v42  ;;  %v1001_v55 = vmax.f32 %v985_v45, 0.0 }
 0x17a   :  { %v988_v54 = vadd.f32 %v978_v27, %v930_v53  ;;  %v1002_v57 = vmax.f32 %v986_v50, 0.0 }
 0x17b   :  { %v1003_v56 = vmax.f32 %v987_v52, 0.0 }
 0x17c   :  { %v1004_v58 = vmax.f32 %v988_v54, 0.0 }
 0x17d   :  { %v1015_v28 = vpack.c.bf16 %v1003_v56, %v1001_v55 }
 0x17e   :  { %v1016_v59 = vpack.c.bf16 %v1004_v58, %v1002_v57  ;;  %v934_v61 = vpop.f32.mrb[8].mxu0  ;;  %v4420_v57 = vld [vmem:[%s5983_s5 + $0x84] ss:$8 sps:$4 sm:$0xff]  }
 0x17f   :  { %v989_v1 = vadd.f32 %v974_v26, %v934_v61  ;;  %v936_v3 = vpop.f32.mrb[9].mxu0  ;;  %v4418_v61 = vld [vmem:[%s5983_s5 + $0x80] ss:$8 sps:$4 sm:$0xff]  }
 0x180   :  { %v990_v4 = vadd.f32 %v978_v27, %v936_v3  ;;  %v938_v38 = vpop.f32.mrb[10].mxu0  ;;  %3752 = vmatprep.mubr.msk.bf16.mxu1 %vm1147_vm6, %v1016_v59  ;;  %v4416_v59 = vld [vmem:[%s5982_s4 + $0x10] sm:$0xff]  }
 0x181   :  { %v991_v5 = vadd.f32 %v974_v26, %v938_v38  ;;  %v940_v6 = vpop.f32.mrb[11].mxu0  ;;  %1210 = vmatmul.mubr.bf16.gmra.mrb[4].mxu1 %v1015_v28  ;;  %v1005_v46 = vmax.f32 %v989_v1, 0.0  ;;  %v4415_v28 = vld [vmem:[%s5982_s4 + $0x8] sm:$0xff]   ;;  %v4423_v1 = vld [vmem:[%s5983_s5 + $0x94] ss:$8 sps:$4 sm:$0xff]  }
 0x182   :  { %v992_v8 = vadd.f32 %v978_v27, %v940_v6  ;;  %v1006_v51 = vmax.f32 %v990_v4, 0.0  ;;  %v4421_v3 = vld [vmem:[%s5983_s5 + $0x90] ss:$8 sps:$4 sm:$0xff]   ;;  %v4426_v4 = vld [vmem:[%s5983_s5 + $0xa4] ss:$8 sps:$4 sm:$0xff]  }
 0x183   :  { %v1007_v9 = vmax.f32 %v991_v5, 0.0  ;;  %v4417_v38 = vld [vmem:[%s5982_s4 + $0x18] sm:$0xff]   ;;  %v4424_v5 = vld [vmem:[%s5983_s5 + $0xa0] ss:$8 sps:$4 sm:$0xff]  }
 0x184   :  { %v1008_v10 = vmax.f32 %v992_v8, 0.0  ;;  %v4429_v6 = vld [vmem:[%s5983_s5 + $0xb4] ss:$8 sps:$4 sm:$0xff]   ;;  %v4427_v8 = vld [vmem:[%s5983_s5 + $0xb0] ss:$8 sps:$4 sm:$0xff]  }
 0x185   :  { %v1017_v11 = vpack.c.bf16 %v1007_v9, %v1005_v46  ;;  %v4430_v46 = vld [vmem:[%s5983_s5 + $0xc0] ss:$8 sps:$4 sm:$0xff]   ;;  %v4432_v9 = vld [vmem:[%s5983_s5 + $0xc4] ss:$8 sps:$4 sm:$0xff]  }
 0x186   :  { %v1018_v47 = vpack.c.bf16 %v1008_v10, %v1006_v51  ;;  %v944_v13 = vpop.f32.mrb[12].mxu0  ;;  %v4435_v51 = vld [vmem:[%s5983_s5 + $0xd4] ss:$8 sps:$4 sm:$0xff]   ;;  %v4433_v10 = vld [vmem:[%s5983_s5 + $0xd0] ss:$8 sps:$4 sm:$0xff]  }
 0x187   :  { %v993_v15 = vadd.f32 %v974_v26, %v944_v13  ;;  %v946_v48 = vpop.f32.mrb[13].mxu0  ;;  %v4441_v13 = vld [vmem:[%s5983_s5 + $0xf4] ss:$8 sps:$4 sm:$0xff]  }
 0x188   :  { %v994_v17 = vadd.f32 %v978_v27, %v946_v48  ;;  %v948_v19 = vpop.f32.mrb[14].mxu0  ;;  %3753 = vmatprep.mubr.msk.bf16.mxu1 %vm1147_vm6, %v1018_v47  ;;  %v4436_v47 = vld [vmem:[%s5983_s5 + $0xe0] ss:$8 sps:$4 sm:$0xff]   ;;  %v4444_v48 = vld [vmem:[%s5983_s5 + $0x4] ss:$8 sps:$4 sm:$0xff]  }
 0x189   :  { %v995_v20 = vadd.f32 %v974_v26, %v948_v19  ;;  %v950_v62 = vpop.f32.mrb[15].mxu0  ;;  %1220 = vmatmul.mubr.bf16.gmra.mrb[8].mxu1 %v1017_v11  ;;  %v1009_v63 = vmax.f32 %v993_v15, 0.0  ;;  %v4438_v11 = vld [vmem:[%s5983_s5 + $0xe4] ss:$8 sps:$4 sm:$0xff]   ;;  %v4439_v15 = vld [vmem:[%s5983_s5 + $0xf0] ss:$8 sps:$4 sm:$0xff]  }
 0x18a   :  { %v996_v60 = vadd.f32 %v978_v27, %v950_v62  ;;  %v1010_v35 = vmax.f32 %v994_v17, 0.0 }
 0x18b   :  { %v1011_v0 = vmax.f32 %v995_v20, 0.0 }
 0x18c   :  { %v1012_v7 = vmax.f32 %v996_v60, 0.0 }
 0x18d   :  { %v1019_v16 = vpack.c.bf16 %v1011_v0, %v1009_v63 }
 0x18e   :  { %v1020_v18 = vpack.c.bf16 %v1012_v7, %v1010_v35 }
 0x190   :  { %3754 = vmatprep.mubr.msk.bf16.mxu1 %vm1147_vm6, %v1020_v18 }
 0x191   :  { %1230 = vmatmul.mubr.bf16.gmra.mrb[12].mxu1 %v1019_v16 }
 0x192   :  { %4145 = vmatprep.mubr.msk.bf16.mxu1 %vm1280_vm7, %v4414_v21 }
 0x24c   :  { %v1201_v22 = vpop.f32.mrb[0].mxu1 }
 0x24d   :  { %v1203_v24 = vpop.f32.mrb[1].mxu1 }
 0x24e   :  { %v1240_v26 = vmax.f32 %v1201_v22, %v1203_v24  ;;  %v1205_v27 = vpop.f32.mrb[2].mxu1 }
 0x24f   :  { %v1207_v29 = vpop.f32.mrb[3].mxu1 }
 0x250   :  { %v1241_v30 = vmax.f32 %v1205_v27, %v1207_v29 }
 0x252   :  { %v1256_v31 = vpack.c.bf16 %v1241_v30, %v1240_v26 }
 0x254   :  { %v1211_v32 = vpop.f32.mrb[4].mxu1  ;;  %4137 = vmatprep.subr.bf16.mxu1 %v1256_v31 }
 0x255   :  { %v1213_v33 = vpop.f32.mrb[5].mxu1  ;;  %4138 = vmatpush3.bf16.msra.mxu1 %v1256_v31 }
 0x256   :  { %v1242_v34 = vmax.f32 %v1211_v32, %v1213_v33  ;;  %v1215_v36 = vpop.f32.mrb[6].mxu1 }
 0x257   :  { %v1217_v37 = vpop.f32.mrb[7].mxu1 }
 0x258   :  { %v1243_v39 = vmax.f32 %v1215_v36, %v1217_v37 }
 0x25a   :  { %v1257_v40 = vpack.c.bf16 %v1243_v39, %v1242_v34 }
 0x25c   :  { %v1221_v12 = vpop.f32.mrb[8].mxu1  ;;  %4139 = vmatprep.subr.bf16.mxu1 %v1257_v40 }
 0x25d   :  { %v1223_v41 = vpop.f32.mrb[9].mxu1  ;;  %4140 = vmatpush3.bf16.msra.mxu1 %v1257_v40 }
 0x25e   :  { %v1244_v42 = vmax.f32 %v1221_v12, %v1223_v41  ;;  %v1225_v43 = vpop.f32.mrb[10].mxu1 }
 0x25f   :  { %v1227_v44 = vpop.f32.mrb[11].mxu1 }
 0x260   :  { %v1245_v45 = vmax.f32 %v1225_v43, %v1227_v44  ;;  %v4442_v44 = vld [vmem:[%s5983_s5] ss:$8 sps:$4 sm:$0xff]  }
 0x262   :  { %v1258_v49 = vpack.c.bf16 %v1245_v45, %v1244_v42 }
 0x264   :  { %v1231_v50 = vpop.f32.mrb[12].mxu1  ;;  %4141 = vmatprep.subr.bf16.mxu1 %v1258_v49 }
 0x265   :  { %v1233_v14 = vpop.f32.mrb[13].mxu1  ;;  %4142 = vmatpush3.bf16.msra.mxu1 %v1258_v49 }
 0x266   :  { %v1246_v52 = vmax.f32 %v1231_v50, %v1233_v14  ;;  %v1235_v53 = vpop.f32.mrb[14].mxu1  ;;  %v4447_v14 = vld [vmem:[%s5983_s5 + $0x14] ss:$8 sps:$4 sm:$0xff]  }
 0x267   :  { %v1237_v54 = vpop.f32.mrb[15].mxu1 }
 0x268   :  { %v1247_v55 = vmax.f32 %v1235_v53, %v1237_v54  ;;  %v4445_v54 = vld [vmem:[%s5983_s5 + $0x10] ss:$8 sps:$4 sm:$0xff]  }
 0x26a   :  { %v1259_v56 = vpack.c.bf16 %v1247_v55, %v1246_v52  ;;  %v4450_v55 = vld [vmem:[%s5983_s5 + $0x24] ss:$8 sps:$4 sm:$0xff]  }
 0x26c   :  { %4285 = vmatprep.subr.msk.bf16.mxu1 %vm800_vm4, %v1259_v56  ;;  %v1295_v58 = vsel %vm800_vm4, %v1259_v56, 0  ;;  %v4448_v56 = vld [vmem:[%s5983_s5 + $0x20] ss:$8 sps:$4 sm:$0xff]  }
 0x26d   :  { %4144 = vmatpush3.bf16.msra.mxu1 %v1295_v58  ;;  %v4453_v58 = vld [vmem:[%s5983_s5 + $0x34] ss:$8 sps:$4 sm:$0xff]  }
 0x26e   :  { %1498 = vmatprep.subr.bf16.mxu1 %v4420_v57 }
 0x270   :  { %4146 = vmatmul.mubr.msk.bf16.vlgmr.msra.gmra.mrb[16].mxu1 %vm1280_vm7, %v4415_v28  ;;  %v4538_v28 = vld [vmem:[%s5985_s7] ss:$8 sps:$4 sm:$0xff]  }
 0x271   :  { %4149 = vmatprep.mubr.msk.bf16.mxu1 %vm1280_vm7, %v4416_v59  ;;  %1499 = vmatpush1.bf16.msra.mxu1 %v4418_v61  ;;  %v4540_v59 = vld [vmem:[%s5985_s7 + $0x4] ss:$8 sps:$4 sm:$0xff]   ;;  %v4451_v61 = vld [vmem:[%s5983_s5 + $0x30] ss:$8 sps:$4 sm:$0xff]  }
 0x272   :  { %1500 = vmatprep.subr.bf16.mxu1 %v4423_v1  ;;  %v4543_v1 = vld [vmem:[%s5985_s7 + $0x14] ss:$8 sps:$4 sm:$0xff]   ;;  %2338 = vmatprep.subr.bf16.mxu0 %v4540_v59  ;;  %v4516_v59 = vld [vmem:[%s5983_s5 + $0x204] ss:$8 sps:$4 sm:$0xff]  }
 0x273   :  { %2339 = vmatpush1.bf16.msra.mxu0 %v4538_v28  ;;  %v4511_v28 = vld [vmem:[%s5983_s5 + $0x1f0] ss:$8 sps:$4 sm:$0xff]  }
 0x274   :  { %2340 = vmatprep.subr.bf16.mxu0 %v4543_v1  ;;  %v4519_v1 = vld [vmem:[%s5983_s5 + $0x214] ss:$8 sps:$4 sm:$0xff]  }
 0x275   :  { %1501 = vmatpush1.bf16.msra.mxu1 %v4421_v3  ;;  %v4456_v3 = vld [vmem:[%s5983_s5 + $0x44] ss:$8 sps:$4 sm:$0xff]  }
 0x276   :  { %1502 = vmatprep.subr.bf16.mxu1 %v4426_v4  ;;  %v4541_v4 = vld [vmem:[%s5985_s7 + $0x10] ss:$8 sps:$4 sm:$0xff]  }
 0x277   :  { %2341 = vmatpush1.bf16.msra.mxu0 %v4541_v4  ;;  %v4522_v4 = vld [vmem:[%s5983_s5 + $0x224] ss:$8 sps:$4 sm:$0xff]  }
 0x278   :  { %4150 = vmatmul.mubr.msk.bf16.gmra.mrb[20].mxu1 %vm1280_vm7, %v4417_v38  ;;  %v4546_v38 = vld [vmem:[%s5985_s7 + $0x24] ss:$8 sps:$4 sm:$0xff]  }
 0x279   :  { %1503 = vmatpush1.bf16.msra.mxu1 %v4424_v5  ;;  %1530 = vmatprep.mubr.bf16.mxu1 %v4727_v2  ;;  %v4454_v5 = vld [vmem:[%s5983_s5 + $0x40] ss:$8 sps:$4 sm:$0xff]  }
 0x27a   :  { %1504 = vmatprep.subr.bf16.mxu1 %v4429_v6  ;;  %v4459_v6 = vld [vmem:[%s5983_s5 + $0x54] ss:$8 sps:$4 sm:$0xff]   ;;  %2342 = vmatprep.subr.bf16.mxu0 %v4546_v38  ;;  %v4520_v38 = vld [vmem:[%s5983_s5 + $0x220] ss:$8 sps:$4 sm:$0xff]  }
 0x27d   :  { %1505 = vmatpush1.bf16.msra.mxu1 %v4427_v8  ;;  %v4544_v8 = vld [vmem:[%s5985_s7 + $0x20] ss:$8 sps:$4 sm:$0xff]  }
 0x27e   :  { %1506 = vmatprep.subr.bf16.mxu1 %v4432_v9  ;;  %v4457_v9 = vld [vmem:[%s5983_s5 + $0x50] ss:$8 sps:$4 sm:$0xff]   ;;  %2343 = vmatpush1.bf16.msra.mxu0 %v4544_v8  ;;  %v4526_v8 = vld [vmem:[%s5983_s5 + $0x240] ss:$8 sps:$4 sm:$0xff]  }
 0x281   :  { %1507 = vmatpush1.bf16.msra.mxu1 %v4430_v46  ;;  %v4549_v46 = vld [vmem:[%s5985_s7 + $0x34] ss:$8 sps:$4 sm:$0xff]  }
 0x282   :  { %1508 = vmatprep.subr.bf16.mxu1 %v4435_v51  ;;  %v4462_v51 = vld [vmem:[%s5983_s5 + $0x64] ss:$8 sps:$4 sm:$0xff]   ;;  %2344 = vmatprep.subr.bf16.mxu0 %v4549_v46  ;;  %v4529_v46 = vld [vmem:[%s5983_s5 + $0x250] ss:$8 sps:$4 sm:$0xff]  }
 0x285   :  { %1509 = vmatpush1.bf16.msra.mxu1 %v4433_v10  ;;  %v4547_v10 = vld [vmem:[%s5985_s7 + $0x30] ss:$8 sps:$4 sm:$0xff]  }
 0x286   :  { %1510 = vmatprep.subr.bf16.mxu1 %v4438_v11  ;;  %v4552_v11 = vld [vmem:[%s5985_s7 + $0x44] ss:$8 sps:$4 sm:$0xff]   ;;  %2345 = vmatpush1.bf16.msra.mxu0 %v4547_v10  ;;  %v4537_v10 = vld [vmem:[%s5983_s5 + $0x274] ss:$8 sps:$4 sm:$0xff]  }
 0x287   :  { %2346 = vmatprep.subr.bf16.mxu0 %v4552_v11  ;;  %v4535_v11 = vld [vmem:[%s5983_s5 + $0x270] ss:$8 sps:$4 sm:$0xff]  }
 0x289   :  { %1511 = vmatpush1.bf16.msra.mxu1 %v4436_v47  ;;  %v4460_v47 = vld [vmem:[%s5983_s5 + $0x60] ss:$8 sps:$4 sm:$0xff]  }
 0x28a   :  { %1512 = vmatprep.subr.bf16.mxu1 %v4441_v13  ;;  %v4465_v13 = vld [vmem:[%s5983_s5 + $0x74] ss:$8 sps:$4 sm:$0xff]  }
 0x28d   :  { %1513 = vmatpush1.bf16.msra.mxu1 %v4439_v15  ;;  %v4550_v15 = vld [vmem:[%s5985_s7 + $0x40] ss:$8 sps:$4 sm:$0xff]  }
 0x28e   :  { %1631 = vmatprep.subr.bf16.mxu1 %v4444_v48  ;;  %v4555_v48 = vld [vmem:[%s5985_s7 + $0x54] ss:$8 sps:$4 sm:$0xff]   ;;  %2347 = vmatpush1.bf16.msra.mxu0 %v4550_v15 }
 0x28f   :  { %2348 = vmatprep.subr.bf16.mxu0 %v4555_v48  ;;  %v4567_v15 = vld [vmem:[%s5985_s7 + $0x94] ss:$8 sps:$4 sm:$0xff]  }
 0x343   :  { %v4147_v17 = vpop.f32.mrb[16].mxu1 }
 0x344   :  { %v1331_v19 = vpop.f32.mrb[17].mxu1 }
 0x345   :  { %v4148_v20 = vpop.f32.mrb[18].mxu1 }
 0x346   :  { %v1334_v62 = vpop.f32.mrb[19].mxu1 }
 0x34b   :  { %v4151_v60 = vpop.f32.mrb[20].mxu1 }
 0x34c   :  { %v1364_v63 = vmax.f32 %v4147_v17, %v4151_v60  ;;  %v1347_v0 = vpop.f32.mrb[21].mxu1  ;;  %v4463_v17 = vld [vmem:[%s5983_s5 + $0x70] ss:$8 sps:$4 sm:$0xff]   ;;  %v4466_v60 = vld [vmem:[%s5983_s5 + $0x100] ss:$8 sps:$4 sm:$0xff]  }
 0x34d   :  { %v1362_v35 = vmax.f32 %v1331_v19, %v1347_v0  ;;  %v4152_v7 = vpop.f32.mrb[22].mxu1  ;;  %v4468_v19 = vld [vmem:[%s5983_s5 + $0x104] ss:$8 sps:$4 sm:$0xff]   ;;  %v4556_v0 = vld [vmem:[%s5985_s7 + $0x60] ss:$8 sps:$4 sm:$0xff]  }
 0x34e   :  { %v1365_v16 = vmax.f32 %v4148_v20, %v4152_v7  ;;  %v1350_v18 = vpop.f32.mrb[23].mxu1  ;;  %v4553_v20 = vld [vmem:[%s5985_s7 + $0x50] ss:$8 sps:$4 sm:$0xff]  }
 0x34f   :  { %v1363_v21 = vmax.f32 %v1334_v62, %v1350_v18  ;;  %v4558_v62 = vld [vmem:[%s5985_s7 + $0x64] ss:$8 sps:$4 sm:$0xff]   ;;  %2349 = vmatpush1.bf16.msra.mxu0 %v4553_v20  ;;  %v4469_v7 = vld [vmem:[%s5983_s5 + $0x110] ss:$8 sps:$4 sm:$0xff]  }
 0x350   :  { %v5286_v22 = vpack.c.bf16 %v1365_v16, %v1364_v63  ;;  %v4471_v63 = vld [vmem:[%s5983_s5 + $0x114] ss:$8 sps:$4 sm:$0xff]   ;;  %2350 = vmatprep.subr.bf16.mxu0 %v4558_v62  ;;  %v4474_v16 = vld [vmem:[%s5983_s5 + $0x124] ss:$8 sps:$4 sm:$0xff]   ;;  %v4559_v18 = vld [vmem:[%s5985_s7 + $0x70] ss:$8 sps:$4 sm:$0xff]  }
 0x351   :  { %v5288_v24 = vpack.c.bf16 %v1363_v21, %v1362_v35  ;;  %v4561_v35 = vld [vmem:[%s5985_s7 + $0x74] ss:$8 sps:$4 sm:$0xff]   ;;  %v4472_v21 = vld [vmem:[%s5983_s5 + $0x120] ss:$8 sps:$4 sm:$0xff]  }
 0x352   :  { %v1409_v26 = vshll.u32 %v5286_v22, 16  ;;  %v1413_v27 = vshrl.u32 %v5286_v22, 16  ;;  %v1704_v29 = vrot.slane %v5286_v22, 1  ;;  %v2034_v30 = vrot.slane %v5286_v22, 2 }
 0x353   :  { %v1402_v31 = vshrl.u32 %v5288_v24, 16  ;;  %v1404_v32 = vshll.u32 %v5288_v24, 16  ;;  %v1703_v33 = vrot.slane %v5288_v24, 1  ;;  %v2033_v34 = vrot.slane %v5288_v24, 2  ;;  %2351 = vmatpush1.bf16.msra.mxu0 %v4556_v0 }
 0x354   :  { %v1869_v36 = vrot.slane %v1413_v27, 1  ;;  %v1870_v37 = vrot.slane %v1409_v26, 2  ;;  %v1411_v49 = vrot.slane %v1409_v26, 1  ;;  %2352 = vmatprep.subr.bf16.mxu0 %v4561_v35  ;;  %v4475_v26 = vld [vmem:[%s5983_s5 + $0x130] ss:$8 sps:$4 sm:$0xff]  }
 0x355   :  { %v1406_v39 = vrot.slane %v1404_v32, 1  ;;  %v5301_v40 = vsel %vm428_vm0, %v1703_v33, %v1704_v29  ;;  %v1866_v12 = vrot.slane %v1402_v31, 1  ;;  %v1867_v41 = vrot.slane %v1404_v32, 2  ;;  %v4483_v32 = vld [vmem:[%s5983_s5 + $0x154] ss:$8 sps:$4 sm:$0xff]  }
 0x356   :  { %v5303_v42 = vor.u32 %v1870_v37, %v1869_v36  ;;  %v5308_v43 = vsel %vm800_vm4, %v2033_v34, %v2034_v30  ;;  %v1415_v57 = vor.u32 %v1413_v27, %v1411_v49  ;;  %v4480_v27 = vld [vmem:[%s5983_s5 + $0x144] ss:$8 sps:$4 sm:$0xff]   ;;  %v4481_v33 = vld [vmem:[%s5983_s5 + $0x150] ss:$8 sps:$4 sm:$0xff]   ;;  %v4484_v36 = vld [vmem:[%s5983_s5 + $0x160] ss:$8 sps:$4 sm:$0xff]  }
 0x357   :  { %v1407_v45 = vor.u32 %v1406_v39, %v1402_v31  ;;  %v1868_v50 = vor.u32 %v1867_v41, %v1866_v12  ;;  %2353 = vmatpush1.bf16.msra.mxu0 %v4559_v18  ;;  %v4478_v31 = vld [vmem:[%s5983_s5 + $0x140] ss:$8 sps:$4 sm:$0xff]   ;;  %v4486_v34 = vld [vmem:[%s5983_s5 + $0x164] ss:$8 sps:$4 sm:$0xff]   ;;  %v4489_v37 = vld [vmem:[%s5983_s5 + $0x174] ss:$8 sps:$4 sm:$0xff]  }
 0x358   :  { %v4487_v39 = vld [vmem:[%s5983_s5 + $0x170] ss:$8 sps:$4 sm:$0xff]   ;;  %v4492_v12 = vld [vmem:[%s5983_s5 + $0x184] ss:$8 sps:$4 sm:$0xff]   ;;  %v4490_v41 = vld [vmem:[%s5983_s5 + $0x180] ss:$8 sps:$4 sm:$0xff]  }
 0x359   :  { %v1412_v52 = vsel %vm92_vm2, %v1407_v45, %v1411_v49  ;;  %v5319_v53 = vsel %vm610_vm1, %v1868_v50, %v5303_v42  ;;  %v4493_v45 = vld [vmem:[%s5983_s5 + $0x190] ss:$8 sps:$4 sm:$0xff]   ;;  %v4498_v49 = vld [vmem:[%s5983_s5 + $0x1a4] ss:$8 sps:$4 sm:$0xff]   ;;  %v4496_v50 = vld [vmem:[%s5983_s5 + $0x1a0] ss:$8 sps:$4 sm:$0xff]  }
 0x35a   :  { %1531 = vmatmul.mubr.bf16.vlgmr.msra.gmra.mrb[24].mxu1 %v1412_v52  ;;  %v4504_v52 = vld [vmem:[%s5983_s5 + $0x1c4] ss:$8 sps:$4 sm:$0xff]  }
 0x35b   :  { %1632 = vmatpush1.bf16.msra.mxu1 %v4442_v44  ;;  %1540 = vmatprep.mubr.bf16.mxu1 %v4727_v2  ;;  %v4495_v44 = vld [vmem:[%s5983_s5 + $0x194] ss:$8 sps:$4 sm:$0xff]  }
 0x35c   :  { %1633 = vmatprep.subr.bf16.mxu1 %v4447_v14  ;;  %v4499_v14 = vld [vmem:[%s5983_s5 + $0x1b0] ss:$8 sps:$4 sm:$0xff]  }
 0x35f   :  { %1634 = vmatpush1.bf16.msra.mxu1 %v4445_v54  ;;  %v4502_v54 = vld [vmem:[%s5983_s5 + $0x1c0] ss:$8 sps:$4 sm:$0xff]  }
 0x360   :  { %1635 = vmatprep.subr.bf16.mxu1 %v4450_v55  ;;  %v4505_v55 = vld [vmem:[%s5983_s5 + $0x1d0] ss:$8 sps:$4 sm:$0xff]  }
 0x362   :  { %1541 = vmatmul.mubr.bf16.gmra.mrb[28].mxu1 %v1415_v57  ;;  %v4508_v57 = vld [vmem:[%s5983_s5 + $0x1e0] ss:$8 sps:$4 sm:$0xff]  }
 0x363   :  { %1636 = vmatpush1.bf16.msra.mxu1 %v4448_v56  ;;  %1663 = vmatprep.mubr.bf16.mxu1 %v4727_v2  ;;  %v4510_v56 = vld [vmem:[%s5983_s5 + $0x1e4] ss:$8 sps:$4 sm:$0xff]  }
 0x364   :  { %1637 = vmatprep.subr.bf16.mxu1 %v4453_v58  ;;  %v4513_v58 = vld [vmem:[%s5983_s5 + $0x1f4] ss:$8 sps:$4 sm:$0xff]  }
 0x367   :  { %1638 = vmatpush1.bf16.msra.mxu1 %v4451_v61  ;;  %v4514_v61 = vld [vmem:[%s5983_s5 + $0x200] ss:$8 sps:$4 sm:$0xff]  }
 0x368   :  { %1639 = vmatprep.subr.bf16.mxu1 %v4456_v3  ;;  %v4517_v3 = vld [vmem:[%s5983_s5 + $0x210] ss:$8 sps:$4 sm:$0xff]  }
 0x36b   :  { %1640 = vmatpush1.bf16.msra.mxu1 %v4454_v5  ;;  %v4523_v5 = vld [vmem:[%s5983_s5 + $0x230] ss:$8 sps:$4 sm:$0xff]  }
 0x36c   :  { %1641 = vmatprep.subr.bf16.mxu1 %v4459_v6  ;;  %v4528_v6 = vld [vmem:[%s5983_s5 + $0x244] ss:$8 sps:$4 sm:$0xff]  }
 0x36f   :  { %1642 = vmatpush1.bf16.msra.mxu1 %v4457_v9  ;;  %v4534_v9 = vld [vmem:[%s5983_s5 + $0x264] ss:$8 sps:$4 sm:$0xff]  }
 0x370   :  { %1643 = vmatprep.subr.bf16.mxu1 %v4462_v51  ;;  %v4532_v51 = vld [vmem:[%s5983_s5 + $0x260] ss:$8 sps:$4 sm:$0xff]  }
 0x373   :  { %1644 = vmatpush1.bf16.msra.mxu1 %v4460_v47  ;;  %v4564_v47 = vld [vmem:[%s5985_s7 + $0x84] ss:$8 sps:$4 sm:$0xff]  }
 0x374   :  { %1645 = vmatprep.subr.bf16.mxu1 %v4465_v13  ;;  %v4562_v13 = vld [vmem:[%s5985_s7 + $0x80] ss:$8 sps:$4 sm:$0xff]   ;;  %2354 = vmatprep.subr.bf16.mxu0 %v4564_v47 }
 0x375   :  { %2355 = vmatpush1.bf16.msra.mxu0 %v4562_v13  ;;  %v4582_v47 = vld [vmem:[%s5987_s9 + $0xc0] ss:$8 sps:$4 sm:$0xff]   ;;  %v4587_v13 = vld [vmem:[%s5987_s9 + $0xd4] ss:$8 sps:$4 sm:$0xff]  }
 0x376   :  { %2356 = vmatprep.subr.bf16.mxu0 %v4567_v15  ;;  %v4585_v15 = vld [vmem:[%s5987_s9 + $0xd0] ss:$8 sps:$4 sm:$0xff]  }
 0x377   :  { %1646 = vmatpush1.bf16.msra.mxu1 %v4463_v17 }
 0x378   :  { %1788 = vmatprep.subr.bf16.mxu1 %v4468_v19 }
 0x37a   :  { %1664 = vmatmul.mubr.bf16.vlgmr.msra.gmra.mrb[24].mxu1 %v5288_v24  ;;  %v4477_v24 = vld [vmem:[%s5983_s5 + $0x134] ss:$8 sps:$4 sm:$0xff]  }
 0x37b   :  { %1789 = vmatpush1.bf16.msra.mxu1 %v4466_v60  ;;  %1673 = vmatprep.mubr.bf16.mxu1 %v4727_v2 }
 0x37c   :  { %1790 = vmatprep.subr.bf16.mxu1 %v4471_v63 }
 0x37f   :  { %1791 = vmatpush1.bf16.msra.mxu1 %v4469_v7 }
 0x380   :  { %1792 = vmatprep.subr.bf16.mxu1 %v4474_v16 }
 0x382   :  { %1674 = vmatmul.mubr.bf16.gmra.mrb[28].mxu1 %v5286_v22  ;;  %v2179_v22 = vld [vmem:[%s5984_s6] sm:$0x3] }
 0x383   :  { %1793 = vmatpush1.bf16.msra.mxu1 %v4472_v21  ;;  %1820 = vmatprep.mubr.bf16.mxu1 %v4727_v2  ;;  %v2188_v48 = vrot.slane %v2179_v22, %v5208_v25 }
 0x384   :  { %1794 = vmatprep.subr.bf16.mxu1 %v4477_v24 }
 0x387   :  { %1795 = vmatpush1.bf16.msra.mxu1 %v4475_v26 }
 0x388   :  { %1796 = vmatprep.subr.bf16.mxu1 %v4480_v27 }
 0x38b   :  { %1797 = vmatpush1.bf16.msra.mxu1 %v4478_v31 }
 0x38c   :  { %1798 = vmatprep.subr.bf16.mxu1 %v4483_v32 }
 0x38f   :  { %1799 = vmatpush1.bf16.msra.mxu1 %v4481_v33 }
 0x390   :  { %1800 = vmatprep.subr.bf16.mxu1 %v4486_v34 }
 0x393   :  { %1801 = vmatpush1.bf16.msra.mxu1 %v4484_v36 }
 0x394   :  { %1802 = vmatprep.subr.bf16.mxu1 %v4489_v37 }
 0x397   :  { %1803 = vmatpush1.bf16.msra.mxu1 %v4487_v39 }
 0x398   :  { %1955 = vmatprep.subr.bf16.mxu1 %v4492_v12 }
 0x39a   :  { %1821 = vmatmul.mubr.bf16.vlgmr.msra.gmra.mrb[24].mxu1 %v5301_v40  ;;  %v4501_v40 = vld [vmem:[%s5983_s5 + $0x1b4] ss:$8 sps:$4 sm:$0xff]  }
 0x39b   :  { %1956 = vmatpush1.bf16.msra.mxu1 %v4490_v41  ;;  %1830 = vmatprep.mubr.bf16.mxu1 %v4727_v2 }
 0x39c   :  { %1957 = vmatprep.subr.bf16.mxu1 %v4495_v44 }
 0x39f   :  { %1958 = vmatpush1.bf16.msra.mxu1 %v4493_v45 }
 0x3a0   :  { %1959 = vmatprep.subr.bf16.mxu1 %v4498_v49 }
 0x3a2   :  { %1831 = vmatmul.mubr.bf16.gmra.mrb[28].mxu1 %v1704_v29  ;;  %v4507_v29 = vld [vmem:[%s5983_s5 + $0x1d4] ss:$8 sps:$4 sm:$0xff]  }
 0x3a3   :  { %1960 = vmatpush1.bf16.msra.mxu1 %v4496_v50  ;;  %1987 = vmatprep.mubr.bf16.mxu1 %v4727_v2 }
 0x3a4   :  { %1961 = vmatprep.subr.bf16.mxu1 %v4501_v40  ;;  %v4568_v40 = vld [vmem:[%s5986_s8] sm:$0xff]  }
 0x3a7   :  { %1962 = vmatpush1.bf16.msra.mxu1 %v4499_v14 }
 0x3a8   :  { %1963 = vmatprep.subr.bf16.mxu1 %v4504_v52 }
 0x3ab   :  { %1964 = vmatpush1.bf16.msra.mxu1 %v4502_v54 }
 0x3ac   :  { %1965 = vmatprep.subr.bf16.mxu1 %v4507_v29 }
 0x3af   :  { %1966 = vmatpush1.bf16.msra.mxu1 %v4505_v55 }
 0x3b0   :  { %1967 = vmatprep.subr.bf16.mxu1 %v4510_v56 }
 0x3b3   :  { %1968 = vmatpush1.bf16.msra.mxu1 %v4508_v57 }
 0x3b4   :  { %1969 = vmatprep.subr.bf16.mxu1 %v4513_v58 }
 0x3b7   :  { %1970 = vmatpush1.bf16.msra.mxu1 %v4511_v28 }
 0x3b8   :  { %2118 = vmatprep.subr.bf16.mxu1 %v4516_v59 }
 0x3ba   :  { %1988 = vmatmul.mubr.bf16.vlgmr.msra.gmra.mrb[24].mxu1 %v5319_v53  ;;  %v4525_v53 = vld [vmem:[%s5983_s5 + $0x234] ss:$8 sps:$4 sm:$0xff]  }
 0x3bb   :  { %2119 = vmatpush1.bf16.msra.mxu1 %v4514_v61  ;;  %1997 = vmatprep.mubr.bf16.mxu1 %v4727_v2 }
 0x3bc   :  { %2120 = vmatprep.subr.bf16.mxu1 %v4519_v1 }
 0x3bf   :  { %2121 = vmatpush1.bf16.msra.mxu1 %v4517_v3 }
 0x3c0   :  { %2122 = vmatprep.subr.bf16.mxu1 %v4522_v4 }
 0x3c2   :  { %1998 = vmatmul.mubr.bf16.gmra.mrb[28].mxu1 %v5303_v42  ;;  %v4531_v42 = vld [vmem:[%s5983_s5 + $0x254] ss:$8 sps:$4 sm:$0xff]  }
 0x3c3   :  { %2123 = vmatpush1.bf16.msra.mxu1 %v4520_v38  ;;  %2150 = vmatprep.mubr.bf16.mxu1 %v4727_v2  ;;  %v4572_v38 = vld [vmem:[%s5987_s9 + $0x84] ss:$8 sps:$4 sm:$0xff]  }
 0x3c4   :  { %2124 = vmatprep.subr.bf16.mxu1 %v4525_v53 }
 0x3c7   :  { %2125 = vmatpush1.bf16.msra.mxu1 %v4523_v5  ;;  %v4569_v5 = vld [vmem:[%s5986_s8 + $0x8] sm:$0xff]  }
 0x3c8   :  { %2126 = vmatprep.subr.bf16.mxu1 %v4528_v6  ;;  %v4570_v6 = vld [vmem:[%s5987_s9 + $0x80] ss:$8 sps:$4 sm:$0xff]  }
 0x3cb   :  { %2127 = vmatpush1.bf16.msra.mxu1 %v4526_v8  ;;  %v4575_v8 = vld [vmem:[%s5987_s9 + $0x94] ss:$8 sps:$4 sm:$0xff]  }
 0x3cc   :  { %2128 = vmatprep.subr.bf16.mxu1 %v4531_v42  ;;  %v4573_v42 = vld [vmem:[%s5987_s9 + $0x90] ss:$8 sps:$4 sm:$0xff]  }
 0x3cf   :  { %2129 = vmatpush1.bf16.msra.mxu1 %v4529_v46  ;;  %v4578_v46 = vld [vmem:[%s5987_s9 + $0xa4] ss:$8 sps:$4 sm:$0xff]  }
 0x3d0   :  { %2130 = vmatprep.subr.bf16.mxu1 %v4534_v9  ;;  %v4576_v9 = vld [vmem:[%s5987_s9 + $0xa0] ss:$8 sps:$4 sm:$0xff]  }
 0x3d3   :  { %2131 = vmatpush1.bf16.msra.mxu1 %v4532_v51  ;;  %v4581_v51 = vld [vmem:[%s5987_s9 + $0xb4] ss:$8 sps:$4 sm:$0xff]  }
 0x3d4   :  { %2132 = vmatprep.subr.bf16.mxu1 %v4537_v10  ;;  %v4579_v10 = vld [vmem:[%s5987_s9 + $0xb0] ss:$8 sps:$4 sm:$0xff]  }
 0x3d7   :  { %2133 = vmatpush1.bf16.msra.mxu1 %v4535_v11  ;;  %v4584_v11 = vld [vmem:[%s5987_s9 + $0xc4] ss:$8 sps:$4 sm:$0xff]  }
 0x3d8   :  { %3302 = vmatprep.subr.bf16.mxu1 %v4727_v2 }
 0x3da   :  { %2151 = vmatmul.mubr.bf16.vlgmr.msra.gmra.mrb[24].mxu1 %v5308_v43  ;;  %v4565_v43 = vld [vmem:[%s5985_s7 + $0x90] ss:$8 sps:$4 sm:$0xff]  }
 0x3db   :  { %2160 = vmatprep.mubr.bf16.mxu1 %v4727_v2  ;;  %2357 = vmatpush1.bf16.msra.mxu0 %v4565_v43  ;;  %v4590_v43 = vld [vmem:[%s5987_s9 + $0xe4] ss:$8 sps:$4 sm:$0xff]  }
 0x3e2   :  { %2161 = vmatmul.mubr.bf16.gmra.mrb[28].mxu1 %v2034_v30  ;;  %v2184_v30 = vrot.slane %v2179_v22, %v5203_v23  ;;  %v4588_v22 = vld [vmem:[%s5987_s9 + $0xe0] ss:$8 sps:$4 sm:$0xff]  }
 0x4ad   :  { %v2152_v17 = vpop.f32.mrb[24].mxu1 }
 0x4ae   :  { %v2191_v19 = vadd.f32 %v2184_v30, %v2152_v17  ;;  %v2154_v20 = vpop.f32.mrb[25].mxu1  ;;  %v4596_v17 = vld [vmem:[%s5987_s9 + $0x4] ss:$8 sps:$4 sm:$0xff]  }
 0x4af   :  { %v2192_v62 = vadd.f32 %v2188_v48, %v2154_v20  ;;  %v2156_v60 = vpop.f32.mrb[26].mxu1 }
 0x4b0   :  { %v2193_v63 = vadd.f32 %v2184_v30, %v2156_v60  ;;  %v2158_v0 = vpop.f32.mrb[27].mxu1  ;;  %v2199_v7 = vmax.f32 %v2191_v19, 0.0 }
 0x4b1   :  { %v2194_v35 = vadd.f32 %v2188_v48, %v2158_v0  ;;  %v2200_v18 = vmax.f32 %v2192_v62, 0.0 }
 0x4b2   :  { %v2201_v16 = vmax.f32 %v2193_v63, 0.0 }
 0x4b3   :  { %v2202_v21 = vmax.f32 %v2194_v35, 0.0 }
 0x4b4   :  { %v2207_v24 = vpack.c.bf16 %v2201_v16, %v2199_v7 }
 0x4b5   :  { %v2208_v26 = vpack.c.bf16 %v2202_v21, %v2200_v18  ;;  %v2162_v27 = vpop.f32.mrb[28].mxu1 }
 0x4b6   :  { %v2195_v31 = vadd.f32 %v2184_v30, %v2162_v27  ;;  %v2164_v32 = vpop.f32.mrb[29].mxu1 }
 0x4b7   :  { %v2196_v33 = vadd.f32 %v2188_v48, %v2164_v32  ;;  %v2166_v34 = vpop.f32.mrb[30].mxu1  ;;  %3927 = vmatprep.mubr.msk.bf16.mxu0 %vm2331_vm8, %v2208_v26  ;;  %v4594_v26 = vld [vmem:[%s5987_s9] ss:$8 sps:$4 sm:$0xff]  }
 0x4b8   :  { %v2197_v36 = vadd.f32 %v2184_v30, %v2166_v34  ;;  %v2168_v37 = vpop.f32.mrb[31].mxu1  ;;  %2371 = vmatmul.mubr.bf16.vlgmr.msra.gmra.mrb[16].mxu0 %v2207_v24  ;;  %v2203_v12 = vmax.f32 %v2195_v31, 0.0  ;;  %v4593_v30 = vld [vmem:[%s5987_s9 + $0xf4] ss:$8 sps:$4 sm:$0xff]   ;;  %v4602_v34 = vld [vmem:[%s5987_s9 + $0x24] ss:$8 sps:$4 sm:$0xff]  }
 0x4b9   :  { %v2198_v39 = vadd.f32 %v2188_v48, %v2168_v37  ;;  %v2204_v44 = vmax.f32 %v2196_v33, 0.0  ;;  %v4591_v48 = vld [vmem:[%s5987_s9 + $0xf0] ss:$8 sps:$4 sm:$0xff]   ;;  %v4599_v31 = vld [vmem:[%s5987_s9 + $0x14] ss:$8 sps:$4 sm:$0xff]  }
 0x4ba   :  { %v2205_v41 = vmax.f32 %v2197_v36, 0.0  ;;  %v4597_v33 = vld [vmem:[%s5987_s9 + $0x10] ss:$8 sps:$4 sm:$0xff]   ;;  %v4600_v36 = vld [vmem:[%s5987_s9 + $0x20] ss:$8 sps:$4 sm:$0xff]  }
 0x4bb   :  { %v2206_v45 = vmax.f32 %v2198_v39, 0.0  ;;  %v4605_v37 = vld [vmem:[%s5987_s9 + $0x34] ss:$8 sps:$4 sm:$0xff]   ;;  %v4603_v39 = vld [vmem:[%s5987_s9 + $0x30] ss:$8 sps:$4 sm:$0xff]  }
 0x4bc   :  { %v2209_v49 = vpack.c.bf16 %v2205_v41, %v2203_v12  ;;  %v4608_v12 = vld [vmem:[%s5987_s9 + $0x44] ss:$8 sps:$4 sm:$0xff]   ;;  %v4606_v41 = vld [vmem:[%s5987_s9 + $0x40] ss:$8 sps:$4 sm:$0xff]  }
 0x4bd   :  { %v2210_v50 = vpack.c.bf16 %v2206_v45, %v2204_v44  ;;  %v4611_v44 = vld [vmem:[%s5987_s9 + $0x54] ss:$8 sps:$4 sm:$0xff]   ;;  %v4609_v45 = vld [vmem:[%s5987_s9 + $0x50] ss:$8 sps:$4 sm:$0xff]  }
 0x4bf   :  { %3928 = vmatprep.mubr.msk.bf16.mxu0 %vm2331_vm8, %v2210_v50  ;;  %v4612_v50 = vld [vmem:[%s5987_s9 + $0x60] ss:$8 sps:$4 sm:$0xff]  }
 0x4c0   :  { %2381 = vmatmul.mubr.bf16.gmra.mrb[20].mxu0 %v2209_v49  ;;  %v4614_v49 = vld [vmem:[%s5987_s9 + $0x64] ss:$8 sps:$4 sm:$0xff]  }
 0x4c1   :  { %4157 = vmatprep.mubr.msk.bf16.mxu0 %vm2411_vm9, %v4568_v40  ;;  %v4617_v40 = vld [vmem:[%s5987_s9 + $0x74] ss:$8 sps:$4 sm:$0xff]  }
 0x58b   :  { %v2372_v14 = vpop.f32.mrb[16].mxu0 }
 0x58c   :  { %v2374_v52 = vpop.f32.mrb[17].mxu0 }
 0x58d   :  { %v2391_v54 = vmax.f32 %v2372_v14, %v2374_v52  ;;  %v2376_v29 = vpop.f32.mrb[18].mxu0  ;;  %v4615_v14 = vld [vmem:[%s5987_s9 + $0x70] ss:$8 sps:$4 sm:$0xff]   ;;  %v4620_v52 = vld [vmem:[%s5987_s9 + $0x104] ss:$8 sps:$4 sm:$0xff]  }
 0x58e   :  { %v2378_v55 = vpop.f32.mrb[19].mxu0 }
 0x58f   :  { %v2392_v56 = vmax.f32 %v2376_v29, %v2378_v55  ;;  %v4623_v29 = vld [vmem:[%s5987_s9 + $0x114] ss:$8 sps:$4 sm:$0xff]   ;;  %v4621_v55 = vld [vmem:[%s5987_s9 + $0x110] ss:$8 sps:$4 sm:$0xff]  }
 0x591   :  { %v2399_v57 = vpack.c.bf16 %v2392_v56, %v2391_v54  ;;  %v4618_v54 = vld [vmem:[%s5987_s9 + $0x100] ss:$8 sps:$4 sm:$0xff]   ;;  %v4626_v56 = vld [vmem:[%s5987_s9 + $0x124] ss:$8 sps:$4 sm:$0xff]  }
 0x593   :  { %v2382_v58 = vpop.f32.mrb[20].mxu0  ;;  %4153 = vmatprep.subr.bf16.mxu0 %v2399_v57 }
 0x594   :  { %v2384_v28 = vpop.f32.mrb[21].mxu0  ;;  %4154 = vmatpush3.bf16.msra.mxu0 %v2399_v57  ;;  %v4624_v57 = vld [vmem:[%s5987_s9 + $0x120] ss:$8 sps:$4 sm:$0xff]  }
 0x595   :  { %v2393_v59 = vmax.f32 %v2382_v58, %v2384_v28  ;;  %v2386_v61 = vpop.f32.mrb[22].mxu0  ;;  %v4629_v58 = vld [vmem:[%s5987_s9 + $0x134] ss:$8 sps:$4 sm:$0xff]   ;;  %v4627_v28 = vld [vmem:[%s5987_s9 + $0x130] ss:$8 sps:$4 sm:$0xff]  }
 0x596   :  { %v2388_v1 = vpop.f32.mrb[23].mxu0 }
 0x597   :  { %v2394_v3 = vmax.f32 %v2386_v61, %v2388_v1  ;;  %v4630_v61 = vld [vmem:[%s5987_s9 + $0x140] ss:$8 sps:$4 sm:$0xff]   ;;  %v4635_v1 = vld [vmem:[%s5987_s9 + $0x154] ss:$8 sps:$4 sm:$0xff]  }
 0x599   :  { %v2400_v4 = vpack.c.bf16 %v2394_v3, %v2393_v59  ;;  %v4632_v59 = vld [vmem:[%s5987_s9 + $0x144] ss:$8 sps:$4 sm:$0xff]   ;;  %v4633_v3 = vld [vmem:[%s5987_s9 + $0x150] ss:$8 sps:$4 sm:$0xff]  }
 0x59b   :  { %4286 = vmatprep.subr.msk.bf16.mxu0 %vm800_vm4, %v2400_v4  ;;  %v2419_v53 = vsel %vm800_vm4, %v2400_v4, 0  ;;  %v4638_v4 = vld [vmem:[%s5987_s9 + $0x164] ss:$8 sps:$4 sm:$0xff]  }
 0x59c   :  { %4156 = vmatpush3.bf16.msra.mxu0 %v2419_v53  ;;  %v4641_v53 = vld [vmem:[%s5987_s9 + $0x174] ss:$8 sps:$4 sm:$0xff]  }
 0x59d   :  { %2594 = vmatprep.subr.bf16.mxu0 %v4572_v38  ;;  %v4636_v38 = vld [vmem:[%s5987_s9 + $0x160] ss:$8 sps:$4 sm:$0xff]  }
 0x59f   :  { %4158 = vmatmul.mubr.msk.bf16.vlgmr.msra.gmra.mrb[24].mxu0 %vm2411_vm9, %v4569_v5  ;;  %v4639_v5 = vld [vmem:[%s5987_s9 + $0x170] ss:$8 sps:$4 sm:$0xff]  }
 0x5a0   :  { %2595 = vmatpush1.bf16.msra.mxu0 %v4570_v6  ;;  %2626 = vmatprep.mubr.bf16.mxu0 %v4727_v2  ;;  %v4644_v6 = vld [vmem:[%s5987_s9 + $0x184] ss:$8 sps:$4 sm:$0xff]  }
 0x5a1   :  { %2596 = vmatprep.subr.bf16.mxu0 %v4575_v8  ;;  %v4642_v8 = vld [vmem:[%s5987_s9 + $0x180] ss:$8 sps:$4 sm:$0xff]  }
 0x5a4   :  { %2597 = vmatpush1.bf16.msra.mxu0 %v4573_v42 }
 0x5a5   :  { %2598 = vmatprep.subr.bf16.mxu0 %v4578_v46  ;;  %v4647_v46 = vld [vmem:[%s5987_s9 + $0x194] ss:$8 sps:$4 sm:$0xff]  }
 0x5a8   :  { %2599 = vmatpush1.bf16.msra.mxu0 %v4576_v9  ;;  %v4645_v9 = vld [vmem:[%s5987_s9 + $0x190] ss:$8 sps:$4 sm:$0xff]  }
 0x5a9   :  { %2600 = vmatprep.subr.bf16.mxu0 %v4581_v51  ;;  %v4650_v51 = vld [vmem:[%s5987_s9 + $0x1a4] ss:$8 sps:$4 sm:$0xff]  }
 0x5ac   :  { %2601 = vmatpush1.bf16.msra.mxu0 %v4579_v10  ;;  %v4648_v10 = vld [vmem:[%s5987_s9 + $0x1a0] ss:$8 sps:$4 sm:$0xff]  }
 0x5ad   :  { %2602 = vmatprep.subr.bf16.mxu0 %v4584_v11  ;;  %v4653_v11 = vld [vmem:[%s5987_s9 + $0x1b4] ss:$8 sps:$4 sm:$0xff]  }
 0x5b0   :  { %2603 = vmatpush1.bf16.msra.mxu0 %v4582_v47  ;;  %v4651_v47 = vld [vmem:[%s5987_s9 + $0x1b0] ss:$8 sps:$4 sm:$0xff]  }
 0x5b1   :  { %2604 = vmatprep.subr.bf16.mxu0 %v4587_v13  ;;  %v4656_v13 = vld [vmem:[%s5987_s9 + $0x1c4] ss:$8 sps:$4 sm:$0xff]  }
 0x5b4   :  { %2605 = vmatpush1.bf16.msra.mxu0 %v4585_v15  ;;  %v4654_v15 = vld [vmem:[%s5987_s9 + $0x1c0] ss:$8 sps:$4 sm:$0xff]  }
 0x5b5   :  { %2606 = vmatprep.subr.bf16.mxu0 %v4590_v43  ;;  %v4659_v43 = vld [vmem:[%s5987_s9 + $0x1d4] ss:$8 sps:$4 sm:$0xff]  }
 0x5b8   :  { %2607 = vmatpush1.bf16.msra.mxu0 %v4588_v22  ;;  %v4657_v22 = vld [vmem:[%s5987_s9 + $0x1d0] ss:$8 sps:$4 sm:$0xff]  }
 0x5b9   :  { %2608 = vmatprep.subr.bf16.mxu0 %v4593_v30  ;;  %v4662_v30 = vld [vmem:[%s5987_s9 + $0x1e4] ss:$8 sps:$4 sm:$0xff]  }
 0x5bc   :  { %2609 = vmatpush1.bf16.msra.mxu0 %v4591_v48  ;;  %v4660_v48 = vld [vmem:[%s5987_s9 + $0x1e0] ss:$8 sps:$4 sm:$0xff]  }
 0x5bd   :  { %2717 = vmatprep.subr.bf16.mxu0 %v4596_v17  ;;  %v4665_v17 = vld [vmem:[%s5987_s9 + $0x1f4] ss:$8 sps:$4 sm:$0xff]  }
 0x672   :  { %v4159_v19 = vpop.f32.mrb[24].mxu0 }
 0x673   :  { %v2455_v20 = vpop.f32.mrb[25].mxu0 }
 0x674   :  { %v2470_v62 = vmax.f32 %v2455_v20, %v4159_v19  ;;  %v4160_v60 = vpop.f32.mrb[26].mxu0  ;;  %v4663_v19 = vld [vmem:[%s5987_s9 + $0x1f0] ss:$8 sps:$4 sm:$0xff]  }
 0x675   :  { %v2458_v63 = vpop.f32.mrb[27].mxu0  ;;  %v4667_v20 = vld [vmem:[%s5990_s12 + $0x78] sm:$0xff]  }
 0x676   :  { %v2471_v0 = vmax.f32 %v2458_v63, %v4160_v60  ;;  %3303 = vmatpush1.bf16.msra.mxu1 %v4667_v20  ;;  %v4669_v60 = vld [vmem:[%s5990_s12 + $0x88] sm:$0xff]   ;;  %v4670_v63 = vld [vmem:[%s5990_s12 + $0x90] sm:$0xff]  }
 0x677   :  { %3304 = vmatprep.subr.bf16.mxu1 %v4727_v2  ;;  %v4698_v20 = vld [vmem:[%s5992_s14 + $0x8] sm:$0xff]  }
 0x678   :  { %v5653_v35 = vpack.c.bf16 %v2471_v0, %v2470_v62  ;;  %v4668_v62 = vld [vmem:[%s5990_s12 + $0x80] sm:$0xff]   ;;  %v4671_v0 = vld [vmem:[%s5990_s12 + $0x98] sm:$0xff]  }
 0x67a   :  { %v2509_v7 = vshll.u32 %v5653_v35, 16  ;;  %v2507_v16 = vshrl.u32 %v5653_v35, 16  ;;  %v2778_v42 = vrot.slane %v5653_v35, 1  ;;  %3305 = vmatpush1.bf16.msra.mxu1 %v4668_v62  ;;  %v4699_v62 = vld [vmem:[%s5992_s14 + $0x10] sm:$0xff]  }
 0x67b   :  { %3306 = vmatprep.subr.bf16.mxu1 %v4727_v2 }
 0x67c   :  { %v2511_v18 = vrot.slane %v2509_v7, 1  ;;  %v5657_v21 = vrot.slane %v2507_v16, 1  ;;  %v5659_v24 = vrot.slane %v2509_v7, 2  ;;  %v4673_v7 = vld [vmem:[%s5990_s12 + $0xa8] sm:$0xff]  }
 0x67e   :  { %v2512_v27 = vor.u32 %v2511_v18, %v2507_v16  ;;  %v2926_v32 = vor.u32 %v5659_v24, %v5657_v21  ;;  %3307 = vmatpush1.bf16.msra.mxu1 %v4669_v60  ;;  %v4674_v16 = vld [vmem:[%s5990_s12 + $0xb0] sm:$0xff]   ;;  %v4675_v18 = vld [vmem:[%s5990_s12 + $0xb8] sm:$0xff]   ;;  %v4676_v21 = vld [vmem:[%s5990_s12 + $0xc0] sm:$0xff]  }
 0x67f   :  { %3308 = vmatprep.subr.bf16.mxu1 %v4727_v2  ;;  %v4677_v24 = vld [vmem:[%s5990_s12 + $0xc8] sm:$0xff]   ;;  %v4701_v60 = vld [vmem:[%s5992_s14 + $0x20] sm:$0xff]  }
 0x680   :  { %2627 = vmatmul.mubr.bf16.vlgmr.msra.gmra.mrb[28].mxu0 %v2512_v27  ;;  %v4679_v27 = vld [vmem:[%s5990_s12 + $0xd8] sm:$0xff]  }
 0x681   :  { %2718 = vmatpush1.bf16.msra.mxu0 %v4594_v26  ;;  %2749 = vmatprep.mubr.bf16.mxu0 %v4727_v2  ;;  %v4678_v26 = vld [vmem:[%s5990_s12 + $0xd0] sm:$0xff]  }
 0x682   :  { %2719 = vmatprep.subr.bf16.mxu0 %v4599_v31  ;;  %3309 = vmatpush1.bf16.msra.mxu1 %v4670_v63  ;;  %v3055_v31 = vld [vmem:[%s5988_s10] sm:$0x3]  ;;  %v4702_v63 = vld [vmem:[%s5992_s14 + $0x28] ss:$0 sps:$4 sm:$0x33]  }
 0x683   :  { %3310 = vmatprep.subr.bf16.mxu1 %v4727_v2 }
 0x685   :  { %2720 = vmatpush1.bf16.msra.mxu0 %v4597_v33  ;;  %v3064_v33 = vrot.slane %v3055_v31, %v5208_v25 }
 0x686   :  { %2721 = vmatprep.subr.bf16.mxu0 %v4602_v34  ;;  %3311 = vmatpush1.bf16.msra.mxu1 %v4671_v0  ;;  %v3542_v0 = vsel %vm3540_vm12, %v4702_v63, 0 }
 0x687   :  { %3312 = vmatprep.subr.bf16.mxu1 %v4727_v2 }
 0x689   :  { %2722 = vmatpush1.bf16.msra.mxu0 %v4600_v36 }
 0x68a   :  { %2723 = vmatprep.subr.bf16.mxu0 %v4605_v37 }
 0x68d   :  { %2724 = vmatpush1.bf16.msra.mxu0 %v4603_v39 }
 0x68e   :  { %2725 = vmatprep.subr.bf16.mxu0 %v4608_v12 }
 0x691   :  { %2726 = vmatpush1.bf16.msra.mxu0 %v4606_v41 }
 0x692   :  { %2727 = vmatprep.subr.bf16.mxu0 %v4611_v44 }
 0x695   :  { %2728 = vmatpush1.bf16.msra.mxu0 %v4609_v45  ;;  %v4728_v45 = vmov 65535  }
 0x696   :  { %2729 = vmatprep.subr.bf16.mxu0 %v4614_v49  ;;  %v3089_v49 = vsel %vm800_vm4, 4294967295, %v4728_v45 }
 0x699   :  { %2730 = vmatpush1.bf16.msra.mxu0 %v4612_v50 }
 0x69a   :  { %2731 = vmatprep.subr.bf16.mxu0 %v4617_v40 }
 0x69d   :  { %2732 = vmatpush1.bf16.msra.mxu0 %v4615_v14 }
 0x69e   :  { %2860 = vmatprep.subr.bf16.mxu0 %v4620_v52 }
 0x6a0   :  { %2750 = vmatmul.mubr.bf16.vlgmr.msra.gmra.mrb[28].mxu0 %v5653_v35  ;;  %v4672_v35 = vld [vmem:[%s5990_s12 + $0xa0] sm:$0xff]  }
 0x6a1   :  { %2861 = vmatpush1.bf16.msra.mxu0 %v4618_v54  ;;  %2892 = vmatprep.mubr.bf16.mxu0 %v4727_v2 }
 0x6a2   :  { %2862 = vmatprep.subr.bf16.mxu0 %v4623_v29  ;;  %3313 = vmatpush1.bf16.msra.mxu1 %v4672_v35 }
 0x6a3   :  { %3314 = vmatprep.subr.bf16.mxu1 %v4727_v2 }
 0x6a5   :  { %2863 = vmatpush1.bf16.msra.mxu0 %v4621_v55 }
 0x6a6   :  { %2864 = vmatprep.subr.bf16.mxu0 %v4626_v56  ;;  %3315 = vmatpush1.bf16.msra.mxu1 %v4673_v7 }
 0x6a7   :  { %3316 = vmatprep.subr.bf16.mxu1 %v4727_v2 }
 0x6a9   :  { %2865 = vmatpush1.bf16.msra.mxu0 %v4624_v57  ;;  %v4666_v57 = vld [vmem:[%s5989_s11] sm:$0xff]  }
 0x6aa   :  { %2866 = vmatprep.subr.bf16.mxu0 %v4629_v58  ;;  %3317 = vmatpush1.bf16.msra.mxu1 %v4674_v16  ;;  %v4680_v58 = vld [vmem:[%s5990_s12 + $0xe0] sm:$0xff]  }
 0x6ab   :  { %3318 = vmatprep.subr.bf16.mxu1 %v4727_v2 }
 0x6ad   :  { %2867 = vmatpush1.bf16.msra.mxu0 %v4627_v28  ;;  %v4681_v28 = vld [vmem:[%s5990_s12 + $0xe8] sm:$0xff]  }
 0x6ae   :  { %2868 = vmatprep.subr.bf16.mxu0 %v4632_v59  ;;  %3319 = vmatpush1.bf16.msra.mxu1 %v4675_v18 }
 0x6af   :  { %3320 = vmatprep.subr.bf16.mxu1 %v4727_v2 }
 0x6b1   :  { %2869 = vmatpush1.bf16.msra.mxu0 %v4630_v61 }
 0x6b2   :  { %2870 = vmatprep.subr.bf16.mxu0 %v4635_v1  ;;  %3321 = vmatpush1.bf16.msra.mxu1 %v4676_v21 }
 0x6b3   :  { %3322 = vmatprep.subr.bf16.mxu1 %v4727_v2 }
 0x6b5   :  { %2871 = vmatpush1.bf16.msra.mxu0 %v4633_v3 }
 0x6b6   :  { %2872 = vmatprep.subr.bf16.mxu0 %v4638_v4  ;;  %3323 = vmatpush1.bf16.msra.mxu1 %v4677_v24  ;;  %v4109_v24 = vld [vmem:[%s5991_s13] ss:$0 sm:$0xff]  ;;  %s4703_s13 = scalar_lea.vmem %s3593_s19, 32 }
 0x6b7   :  { %3324 = vmatprep.subr.bf16.mxu1 %v4727_v2  ;;  %p4704_p0 = scmp.ne.s32.totalorder %s3593_s19, %s4703_s13  ;;  %p4709_p2 = scmp.lt.s32.totalorder %s4703_s13, %s4703_s13 }
 0x6b9   :  { %2873 = vmatpush1.bf16.msra.mxu0 %v4636_v38  ;;  %p4710_p3 = por %p4709_p2, %p4708_p1 }
 0x6ba   :  { %2874 = vmatprep.subr.bf16.mxu0 %v4641_v53  ;;  %3325 = vmatpush1.bf16.msra.mxu1 %v4678_v26 }
 0x6bb   :  { %3326 = vmatprep.subr.bf16.mxu1 %v4727_v2  ;;  %p4711_p4 = pnand %p4710_p3, %p4704_p0 }
 0x6bd   :  { %2875 = vmatpush1.bf16.msra.mxu0 %v4639_v5  ;;  %v4682_v5 = vld [vmem:[%s5990_s12] sm:$0xff]  }
 0x6be   :  { %3008 = vmatprep.subr.bf16.mxu0 %v4644_v6  ;;  %3327 = vmatpush1.bf16.msra.mxu1 %v4679_v27 }
 0x6bf   :  { %3328 = vmatprep.subr.bf16.mxu1 %v4727_v2 }
 0x6c0   :  { %2893 = vmatmul.mubr.bf16.vlgmr.msra.gmra.mrb[28].mxu0 %v2778_v42  ;;  %v4684_v42 = vld [vmem:[%s5990_s12 + $0x10] sm:$0xff]  }
 0x6c1   :  { %3009 = vmatpush1.bf16.msra.mxu0 %v4642_v8  ;;  %3040 = vmatprep.mubr.bf16.mxu0 %v4727_v2  ;;  %v4683_v8 = vld [vmem:[%s5990_s12 + $0x8] sm:$0xff]  }
 0x6c2   :  { %3010 = vmatprep.subr.bf16.mxu0 %v4647_v46  ;;  %3329 = vmatpush1.bf16.msra.mxu1 %v4680_v58  ;;  %v4685_v46 = vld [vmem:[%s5990_s12 + $0x18] sm:$0xff]  }
 0x6c3   :  { %3330 = vmatprep.subr.bf16.mxu1 %v4727_v2 }
 0x6c5   :  { %3011 = vmatpush1.bf16.msra.mxu0 %v4645_v9  ;;  %v4686_v9 = vld [vmem:[%s5990_s12 + $0x20] sm:$0xff]  }
 0x6c6   :  { %3012 = vmatprep.subr.bf16.mxu0 %v4650_v51  ;;  %3331 = vmatpush1.bf16.msra.mxu1 %v4681_v28  ;;  %v4687_v51 = vld [vmem:[%s5990_s12 + $0x28] sm:$0xff]  }
 0x6c7   :  { %3435 = vmatprep.subr.bf16.mxu1 %v4727_v2 }
 0x6c9   :  { %3013 = vmatpush1.bf16.msra.mxu0 %v4648_v10  ;;  %v4688_v10 = vld [vmem:[%s5990_s12 + $0x30] sm:$0xff]  }
 0x6ca   :  { %3014 = vmatprep.subr.bf16.mxu0 %v4653_v11  ;;  %v4689_v11 = vld [vmem:[%s5990_s12 + $0x38] sm:$0xff]  }
 0x6cd   :  { %3015 = vmatpush1.bf16.msra.mxu0 %v4651_v47  ;;  %v4690_v47 = vld [vmem:[%s5990_s12 + $0x40] sm:$0xff]  }
 0x6ce   :  { %3016 = vmatprep.subr.bf16.mxu0 %v4656_v13  ;;  %v4691_v13 = vld [vmem:[%s5990_s12 + $0x48] sm:$0xff]  }
 0x6d1   :  { %3017 = vmatpush1.bf16.msra.mxu0 %v4654_v15  ;;  %v4692_v15 = vld [vmem:[%s5990_s12 + $0x50] sm:$0xff]  }
 0x6d2   :  { %3018 = vmatprep.subr.bf16.mxu0 %v4659_v43  ;;  %v4693_v43 = vld [vmem:[%s5990_s12 + $0x58] sm:$0xff]  }
 0x6d5   :  { %3019 = vmatpush1.bf16.msra.mxu0 %v4657_v22  ;;  %v4694_v22 = vld [vmem:[%s5990_s12 + $0x60] sm:$0xff]  }
 0x6d6   :  { %3020 = vmatprep.subr.bf16.mxu0 %v4662_v30  ;;  %v4695_v30 = vld [vmem:[%s5990_s12 + $0x68] sm:$0xff]  }
 0x6d9   :  { %3021 = vmatpush1.bf16.msra.mxu0 %v4660_v48  ;;  %v4696_v48 = vld [vmem:[%s5990_s12 + $0x70] sm:$0xff]  }
 0x6da   :  { %3022 = vmatprep.subr.bf16.mxu0 %v4665_v17  ;;  %v4697_v17 = vld [vmem:[%s5992_s14] sm:$0xff]  }
 0x6dd   :  { %3023 = vmatpush1.bf16.msra.mxu0 %v4663_v19  ;;  %v4729_v19 = vmov 0.0  }
 0x6e0   :  { %3041 = vmatmul.mubr.bf16.vlgmr.msra.gmra.mrb[28].mxu0 %v2926_v32  ;;  %v3060_v32 = vrot.slane %v3055_v31, %v5203_v23  ;;  %v3090_v23 = vsel %vm428_vm0, %v3089_v49, 0 }
 0x6e1   :  { %3129 = vmatprep.mubr.bf16.mxu0 %v4727_v2 }
 0x7b3   :  { %v3042_v34 = vpop.f32.mrb[28].mxu0 }
 0x7b4   :  { %v3067_v36 = vadd.f32 %v3060_v32, %v3042_v34  ;;  %v3044_v37 = vpop.f32.mrb[29].mxu0 }
 0x7b5   :  { %v3068_v39 = vadd.f32 %v3064_v33, %v3044_v37  ;;  %v3046_v12 = vpop.f32.mrb[30].mxu0  ;;  %v4110_v37 = vld [vmem:[%s5993_s15] ss:$0 sm:$0xff] }
 0x7b6   :  { %v3069_v41 = vadd.f32 %v3060_v32, %v3046_v12  ;;  %v3048_v44 = vpop.f32.mrb[31].mxu0  ;;  %v3071_v40 = vmax.f32 %v3067_v36, 0.0 }
 0x7b7   :  { %v3070_v50 = vadd.f32 %v3064_v33, %v3048_v44  ;;  %v3072_v52 = vmax.f32 %v3068_v39, 0.0 }
 0x7b8   :  { %v3073_v14 = vmax.f32 %v3069_v41, 0.0 }
 0x7b9   :  { %v3074_v54 = vmax.f32 %v3070_v50, 0.0 }
 0x7ba   :  { %v3077_v29 = vpack.c.bf16 %v3073_v14, %v3071_v40 }
 0x7bb   :  { %v3078_v55 = vpack.c.bf16 %v3074_v54, %v3072_v52 }
 0x7bc   :  { %v3092_v56 = vand.u32 %v3090_v23, %v3077_v29 }
 0x7bd   :  { %v3095_v25 = vand.u32 %v3090_v23, %v3078_v55 }
 0x7bf   :  { %3097 = vmatprep.subr.bf16.mxu0 %v3095_v25 }
 0x7c0   :  { %3098 = vmatpush1.bf16.msra.mxu0 %v3092_v56 }
 0x7c1   :  { %4161 = vmatprep.subr.bf16.mxu0 %v4729_v19 }
 0x7c3   :  { %4046 = vmatmul.mubr.msk.bf16.vlgmr.msra.gmra.mrb[32].mxu0 %vm3084_vm10, %v4666_v57 }
 0x7c4   :  { %4162 = vmatpush3.bf16.msra.mxu0 %v4697_v17  ;;  %4173 = vmatprep.mubr.msk.bf16.mxu0 %vm4730_vm13, %v4729_v19 }
 0x7c5   :  { %4163 = vmatprep.subr.bf16.mxu0 %v4729_v19 }
 0x7c8   :  { %4164 = vmatpush3.bf16.msra.mxu0 %v4698_v20 }
 0x7c9   :  { %4165 = vmatprep.subr.bf16.mxu0 %v4729_v19 }
 0x7cc   :  { %4166 = vmatpush3.bf16.msra.mxu0 %v4699_v62 }
 0x7cd   :  { %4167 = vmatprep.subr.bf16.mxu0 %v4729_v19 }
 0x896   :  { %v3131_v59 = vpop.f32.mrb[32].mxu0 }
 0x897   :  { %v3133_v61 = vpop.f32.mrb[33].mxu0 }
 0x898   :  { %v3135_v1 = vpop.f32.mrb[34].mxu0 }
 0x899   :  { %v3140_v3 = vpack.c.bf16 %v3135_v1, %v3131_v59  ;;  %v3137_v4 = vpop.f32.mrb[35].mxu0 }
 0x89a   :  { %v3141_v38 = vpack.c.bf16 %v3137_v4, %v3133_v61 }
 0x89b   :  { %v3205_v6 = vrot.slane %v3140_v3, 4 }
 0x89c   :  { %v3206_v53 = vrot.slane %v3141_v38, 4 }
 0x89e   :  { %4092 = vmatprep.mubr.msk.bf16.mxu1 %vm3298_vm11, %v3206_v53 }
 0x89f   :  { %3335 = vmatmul.mubr.bf16.vlgmr.msra.gmra.mrb[32].mxu1 %v3205_v6 }
 0x8a0   :  { %3436 = vmatpush1.bf16.msra.mxu1 %v4682_v5  ;;  %4108 = vmatprep.mubr.msk.bf16.mxu1 %vm3298_vm11, %v3141_v38 }
 0x8a1   :  { %3437 = vmatprep.subr.bf16.mxu1 %v4727_v2 }
 0x8a4   :  { %3438 = vmatpush1.bf16.msra.mxu1 %v4683_v8 }
 0x8a5   :  { %3439 = vmatprep.subr.bf16.mxu1 %v4727_v2 }
 0x8a8   :  { %3440 = vmatpush1.bf16.msra.mxu1 %v4684_v42 }
 0x8a9   :  { %3441 = vmatprep.subr.bf16.mxu1 %v4727_v2 }
 0x8ac   :  { %3442 = vmatpush1.bf16.msra.mxu1 %v4685_v46 }
 0x8ad   :  { %3443 = vmatprep.subr.bf16.mxu1 %v4727_v2 }
 0x8b0   :  { %3444 = vmatpush1.bf16.msra.mxu1 %v4686_v9 }
 0x8b1   :  { %3445 = vmatprep.subr.bf16.mxu1 %v4727_v2 }
 0x8b4   :  { %3446 = vmatpush1.bf16.msra.mxu1 %v4687_v51 }
 0x8b5   :  { %3447 = vmatprep.subr.bf16.mxu1 %v4727_v2 }
 0x8b8   :  { %3448 = vmatpush1.bf16.msra.mxu1 %v4688_v10 }
 0x8b9   :  { %3449 = vmatprep.subr.bf16.mxu1 %v4727_v2 }
 0x8bc   :  { %3450 = vmatpush1.bf16.msra.mxu1 %v4689_v11 }
 0x8bd   :  { %3451 = vmatprep.subr.bf16.mxu1 %v4727_v2 }
 0x8c0   :  { %3452 = vmatpush1.bf16.msra.mxu1 %v4690_v47 }
 0x8c1   :  { %3453 = vmatprep.subr.bf16.mxu1 %v4727_v2 }
 0x8c4   :  { %3454 = vmatpush1.bf16.msra.mxu1 %v4691_v13 }
 0x8c5   :  { %3455 = vmatprep.subr.bf16.mxu1 %v4727_v2 }
 0x8c8   :  { %3456 = vmatpush1.bf16.msra.mxu1 %v4692_v15 }
 0x8c9   :  { %3457 = vmatprep.subr.bf16.mxu1 %v4727_v2 }
 0x8cc   :  { %3458 = vmatpush1.bf16.msra.mxu1 %v4693_v43 }
 0x8cd   :  { %3459 = vmatprep.subr.bf16.mxu1 %v4727_v2 }
 0x8d0   :  { %3460 = vmatpush1.bf16.msra.mxu1 %v4694_v22 }
 0x8d1   :  { %3461 = vmatprep.subr.bf16.mxu1 %v4727_v2 }
 0x8d4   :  { %3462 = vmatpush1.bf16.msra.mxu1 %v4695_v30 }
 0x8d5   :  { %3463 = vmatprep.subr.bf16.mxu1 %v4727_v2  ;;  %v4700_v2 = vld [vmem:[%s5992_s14 + $0x18] sm:$0xff]  }
 0x8d6   :  { %4168 = vmatpush3.bf16.msra.mxu0 %v4700_v2 }
 0x8d7   :  { %4169 = vmatprep.subr.bf16.mxu0 %v4729_v19 }
 0x8d8   :  { %3464 = vmatpush1.bf16.msra.mxu1 %v4696_v48 }
 0x8da   :  { %4170 = vmatpush3.bf16.msra.mxu0 %v4701_v60 }
 0x8db   :  { %3468 = vmatmul.mubr.bf16.vlgmr.msra.gmra.mrb[36].mxu1 %v3140_v3  ;;  %4171 = vmatprep.subr.bf16.mxu0 %v4729_v19 }
 0x8de   :  { %4172 = vmatpush3.bf16.msra.mxu0 %v3542_v0 }
 0x972   :  { %v3336_v35 = vpop.f32.mrb[32].mxu1 }
 0x973   :  { %v3338_v7 = vpop.f32.mrb[33].mxu1 }
 0x974   :  { %v3339_v16 = vpop.f32.mrb[34].mxu1 }
 0x975   :  { %v3340_v18 = vpop.f32.mrb[35].mxu1 }
 0x9ae   :  { %v3469_v21 = vpop.f32.mrb[36].mxu1 }
 0x9af   :  { %v3470_v26 = vadd.f32 %v3469_v21, %v3336_v35  ;;  %v3471_v27 = vpop.f32.mrb[37].mxu1 }
 0x9b0   :  { %v3472_v31 = vpop.f32.mrb[38].mxu1 }
 0x9b1   :  { %v3482_v32 = vadd.f32 %v4109_v24, %v3470_v26  ;;  %v3473_v33 = vpop.f32.mrb[39].mxu1 }
 0x9b3   :  { %v3483_v34 = vmax.f32 %v3482_v32, 0.0 }
 0x9b5   :  { %v3484_v36 = vpack.c.bf16 %v3483_v34, %v3483_v34 }
 0x9b7   :  { %4174 = vmatmul.mubr.msk.bf16.vlgmr.msra.gmra.mrb[36].mxu0 %vm3536_vm14, %v3484_v36 }
 0xa8a   :  { %v3578_v39 = vpop.f32.mrb[36].mxu0 }
 0xa8b   :  { %v3579_v12 = vadd.f32 %v4110_v37, %v3578_v39  ;;  %v4175_v41 = vpop.f32.mrb[37].mxu0 }
 0xa8c   :  { %v3581_v44 = vpop.f32.mrb[38].mxu0 }
 0xa8d   :  { %v4176_v45 = vpop.f32.mrb[39].mxu0  ;;  %3585 = vst.msk [vmem:[#allocation2] sm:$0x3] %vm3584_vm15, %v3579_v12 }
 0xa8e   :  { %4714 = shalt.err (!%p4711_p4)
}
 0xa8f   :  { %s4715_s15 = scalar_lea.hbm %s5994_s16, 32 }
 0xa90   :  { %p4716_p5 = scmp.ne.s32.totalorder %s5994_s16, %s4715_s15  ;;  %p4719_p6 = scmp.lt.u32.totalorder %s4715_s15, %s5994_s16 }
 0xa92   :  { %p4721_p7 = pnand %p4719_p6, %p4716_p5 }
 0xa94   :  { %4724 = shalt.err (!%p4721_p7)
}
 0xa95   :  { %3595 = dma.vmem_to_hbm [thread:$0]  %s3593_s19, 32, %s5994_s16, [#allocation3]  }
 0xa96   :  { %4725 = dma.done.wait [#allocation3], 32  }
 0xa97   :  { %4726 = vsyncadd [#allocation3], 4294967264 }
 0xa98   :  { %3599 = vsyncpa [#allocation3], 1 }

</bundles_post_ra>
